<compile_context>
chip_gen: v7x
topology: tpu7x:2x2x1
jax: 0.10.0
libtpu: 0.0.40
codegen_flags: <defaults>
</compile_context>

<pallas_src>
import functools

import jax
import jax.numpy as jnp
import numpy as np
from jax import lax
from jax.experimental import pallas as pl
from jax.experimental.pallas import tpu as pltpu

EPS = 1e-5  # nn.InstanceNorm2d default


# --------------------------------------------------------------------------- #
# Weight packing (PyTorch ConvTranspose2d layout [Cin, Cout, 4, 4]).
# Output pixel (2h+a, 2w+b) sums x_pad[h+s_h, w+s_w] against kernel tap
# (kh, kw) = (a+3-2*s_h, b+3-2*s_w), with s_h in {a, a+1}, s_w in {b, b+1}.
# --------------------------------------------------------------------------- #
def _pack_weight_single(weight, dtype):
    """-> [9*Cin, 4*Cout]; tap row-block = s_h*3+s_w, phase col-block = a*2+b.
    Unused taps stay zero (2.25x pad in exchange for one K=9*Cin MXU push)."""
    Cin, Cout = weight.shape[0], weight.shape[1]
    w = jnp.zeros((9 * Cin, 4 * Cout), jnp.float32)
    for a in range(2):
        for b in range(2):
            p = a * 2 + b
            for s_h in (a, a + 1):
                kh = a + 3 - 2 * s_h
                for s_w in (b, b + 1):
                    kw = b + 3 - 2 * s_w
                    tap = s_h * 3 + s_w
                    w = w.at[tap * Cin:(tap + 1) * Cin,
                             p * Cout:(p + 1) * Cout].set(weight[:, :, kh, kw])
    return w.astype(dtype)


def _pack_weight_phase(weight, dtype):
    """-> [4, 4*Cin, Cout]; block p = a*2+b holds only that phase's 4 live taps."""
    Cin, Cout = weight.shape[0], weight.shape[1]
    w = jnp.zeros((4, 4 * Cin, Cout), jnp.float32)
    for a in range(2):
        for b in range(2):
            p = a * 2 + b
            j = 0
            for s_h in (a, a + 1):
                kh = a + 3 - 2 * s_h
                for s_w in (b, b + 1):
                    kw = b + 3 - 2 * s_w
                    w = w.at[p, j * Cin:(j + 1) * Cin, :].set(weight[:, :, kh, kw])
                    j += 1
    return w.astype(dtype)


# --------------------------------------------------------------------------- #
# Kernels
# --------------------------------------------------------------------------- #
def _conv_tile(xp_ref, w_ref, *, TH, W, Cin, phase_matmul):
    """Raw deconv result for row-tile t of the current image: [TH*W, 4*Cout] f32."""
    row0 = pl.program_id(1) * TH
    if TH % 8 == 0:
        row0 = pl.multiple_of(row0, 8)
    # 3x3 shifted windows of the zero-padded input (vld/VPU work, hides under MXU).
    # TODO(synk): a VMEM-scratch-targeted im2col build could avoid the pre-concat
    # tap copies when Cin < 128; kept as concatenate for simplicity.
    taps = {}
    for s_h in range(3):
        rows = xp_ref[0, pl.ds(row0 + s_h, TH), :, :]          # [TH, W+2, Cin]
        for s_w in range(3):
            taps[(s_h, s_w)] = rows[:, s_w:s_w + W, :]         # [TH, W, Cin]
    if phase_matmul:
        # 4 per-phase matmuls: only the 4 live taps each -> no zero-MAC waste.
        outs = []
        for a in range(2):
            for b in range(2):
                lhs = jnp.concatenate(
                    [taps[(sh, sw)] for sh in (a, a + 1) for sw in (b, b + 1)],
                    axis=-1).reshape(TH * W, 4 * Cin)
                outs.append(jnp.dot(lhs, w_ref[a * 2 + b],
                                    preferred_element_type=jnp.float32))
        return jnp.concatenate(outs, axis=-1)                  # [TH*W, 4*Cout]
    # Single MXU push: K = 9*Cin, all 4 phases emitted lane-dense.
    lhs = jnp.concatenate([taps[(sh, sw)] for sh in range(3) for sw in range(3)],
                          axis=-1).reshape(TH * W, 9 * Cin)
    return jnp.dot(lhs, w_ref[...], preferred_element_type=jnp.float32)


def _tile_stats(r):
    return jnp.concatenate([jnp.sum(r, axis=0, keepdims=True),
                            jnp.sum(r * r, axis=0, keepdims=True)], axis=0)


def _stats_kernel(xp_ref, w_ref, stat_ref, *, TH, W, Cin, phase_matmul):
    # Recompute mode, pass 1: statistics only, y_raw never hits HBM.
    r = _conv_tile(xp_ref, w_ref, TH=TH, W=W, Cin=Cin, phase_matmul=phase_matmul)
    stat_ref[0, 0] = _tile_stats(r)                            # [2, 4*Cout] f32


def _conv_stats_kernel(xp_ref, w_ref, y_ref, stat_ref, *, TH, W, Cin, phase_matmul):
    # Materialize mode, pass 1: stream raw conv (bf16) + stats (from f32 acc).
    r = _conv_tile(xp_ref, w_ref, TH=TH, W=W, Cin=Cin, phase_matmul=phase_matmul)
    y_ref[0] = r.astype(y_ref.dtype)
    stat_ref[0, 0] = _tile_stats(r)


def _conv_norm_kernel(xp_ref, w_ref, mu_ref, rstd_ref, o_ref, *, TH, W, Cin,
                      phase_matmul):
    # Recompute mode, pass 2: conv again + normalize + ReLU (all norm math f32).
    r = _conv_tile(xp_ref, w_ref, TH=TH, W=W, Cin=Cin, phase_matmul=phase_matmul)
    o_ref[0] = jnp.maximum((r - mu_ref[0]) * rstd_ref[0], 0.0).astype(o_ref.dtype)


def _norm_relu_kernel(y_ref, mu_ref, rstd_ref, o_ref):
    # Materialize mode, pass 2: pure normalize stream over the bf16 intermediate.
    y = y_ref[0].astype(jnp.float32)
    o_ref[0] = jnp.maximum((y - mu_ref[0]) * rstd_ref[0], 0.0).astype(o_ref.dtype)


# --------------------------------------------------------------------------- #
# Tiling / VMEM sizing
# --------------------------------------------------------------------------- #
def _vmem_limit_bytes():
    try:
        cap = int(pltpu.get_tpu_info().vmem_capacity_bytes)
        if cap <= 0:
            cap = 64 * 1024 * 1024
    except Exception:                       # unknown chip -> size for v7x (64 MiB)
        cap = 64 * 1024 * 1024
    # ~85% of physical, capped, floored: ~54 MiB on v7x, ~108 MiB on v5e/v6e.
    return max(32 * 1024 * 1024, min(int(cap * 0.85), 112 * 1024 * 1024))


def _pick_row_tile(H, W, Cin, Cout, *, mat_bytes, inter_bytes, phase_matmul,
                   vmem_limit):
    """Largest divisor TH of H whose per-grid-step VMEM footprint fits the budget,
    preferring TH*W multiples of 256 (fills the 2x256^2 MXU; >=128 covers v5e)."""
    w_elems = (16 if phase_matmul else 36) * Cin * Cout
    # Resident (TH-independent) blocks are double-buffered by default.
    resident = 2 * ((H + 2) * (W + 2) * Cin + w_elems) * mat_bytes
    budget = max(2 << 20, int(0.6 * (vmem_limit - resident)))
    lhs_elems = (16 if phase_matmul else 9) * Cin
    # Per output row: 2x intermediate blk + 2x f32 out blk + f32 acc + taps + LHS.
    per_row = W * (4 * Cout * (2 * inter_bytes + 2 * 4 + 4)
                   + (9 * Cin + lhs_elems) * mat_bytes)
    cands = [d for d in range(1, H + 1)
             if H % d == 0 and ((d * W) % 8 == 0 or d == H)]
    fits = [d for d in cands if d * per_row <= budget]
    if not fits:
        return min(cands)
    for align in (256, 128, 8):
        tier = [d for d in fits if (d * W) % align == 0]
        if tier:
            return max(tier)
    return max(fits)


# --------------------------------------------------------------------------- #
# Forward
# --------------------------------------------------------------------------- #
def up_forward(x_nchw, skip_nchw, weight, *, row_tile=None,
               matmul_dtype=jnp.bfloat16, intermediate_dtype=None,
               phase_matmul=None, recompute_conv=None):
    """x_nchw: [N, Cin, H, W], skip_nchw: [N, Cskip, 2H, 2W],
    weight: [Cin, Cout, 4, 4] (PyTorch ConvTranspose2d layout).
    matmul_dtype=jnp.float32 gives PyTorch-exact numerics; the bf16 default feeds
    the MXU at native rate (accumulation + InstanceNorm stats stay f32)."""
    N, Cin, H, W = x_nchw.shape
    Cout = weight.shape[1]
    if intermediate_dtype is None:
        intermediate_dtype = matmul_dtype
    if phase_matmul is None:          # MXU-bound -> drop the 2.25x zero-tap MACs
        phase_matmul = Cin * Cout >= 4096
    if recompute_conv is None:        # mem-bound -> never materialize y_raw
        recompute_conv = Cin <= 128

    vmem_limit = _vmem_limit_bytes()
    mat_bytes = jnp.dtype(matmul_dtype).itemsize
    inter_bytes = 0 if recompute_conv else jnp.dtype(intermediate_dtype).itemsize
    if row_tile is None:
        TH = _pick_row_tile(H, W, Cin, Cout, mat_bytes=mat_bytes,
                            inter_bytes=inter_bytes, phase_matmul=phase_matmul,
                            vmem_limit=vmem_limit)
    else:
        TH = int(row_tile)
        if H % TH != 0 or ((TH * W) % 8 != 0 and TH != H):
            raise ValueError(
                f"row_tile={TH} must divide H={H} with row_tile*W % 8 == 0")
    T = H // TH

    # NCHW -> NHWC + 1-pixel zero halo (small input; one cheap XLA pass).
    x = jnp.transpose(x_nchw, (0, 2, 3, 1))
    xp = jnp.pad(x, ((0, 0), (1, 1), (1, 1), (0, 0))).astype(matmul_dtype)
    if phase_matmul:
        wmat = _pack_weight_phase(weight, matmul_dtype)
        w_spec = pl.BlockSpec((4, 4 * Cin, Cout), lambda n, t: (0, 0, 0))
    else:
        wmat = _pack_weight_single(weight, matmul_dtype)
        w_spec = pl.BlockSpec((9 * Cin, 4 * Cout), lambda n, t: (0, 0))

    xp_spec = pl.BlockSpec((1, H + 2, W + 2, Cin), lambda n, t: (n, 0, 0, 0))
    y_spec = pl.BlockSpec((1, TH * W, 4 * Cout), lambda n, t: (n, t, 0))
    stat_spec = pl.BlockSpec((1, 1, 2, 4 * Cout), lambda n, t: (n, t, 0, 0))
    scal_spec = pl.BlockSpec((1, 1, 4 * Cout), lambda n, t: (n, 0, 0))
    # TODO(synk): pipeline_mode=pl.Buffered(1) on the index-invariant xp/wmat blocks
    # would reclaim their second VMEM buffer on v7x; kept default for portability
    # and accounted for in _pick_row_tile instead.
    cparams = pltpu.CompilerParams(
        dimension_semantics=("parallel", "parallel"),
        vmem_limit_bytes=vmem_limit)
    kargs = dict(TH=TH, W=W, Cin=Cin, phase_matmul=phase_matmul)
    stat_shape = jax.ShapeDtypeStruct((N, T, 2, 4 * Cout), jnp.float32)

    # ---- Pass 1: InstanceNorm statistics (+ bf16 y_raw if materializing). ------
    if recompute_conv:
        stats = pl.pallas_call(
            functools.partial(_stats_kernel, **kargs),
            out_shape=stat_shape,
            grid_spec=pltpu.PrefetchScalarGridSpec(
                num_scalar_prefetch=0, grid=(N, T),
                in_specs=[xp_spec, w_spec], out_specs=stat_spec),
            compiler_params=cparams,
        )(xp, wmat)
        y_raw = None
    else:
        y_raw, stats = pl.pallas_call(
            functools.partial(_conv_stats_kernel, **kargs),
            out_shape=(jax.ShapeDtypeStruct((N, H * W, 4 * Cout),
                                            intermediate_dtype), stat_shape),
            grid_spec=pltpu.PrefetchScalarGridSpec(
                num_scalar_prefetch=0, grid=(N, T),
                in_specs=[xp_spec, w_spec], out_specs=(y_spec, stat_spec)),
            compiler_params=cparams,
        )(xp, wmat)

    # ---- Fold stats (tiny [N, Cout] XLA work, f32 throughout). -----------------
    cnt = jnp.float32(4 * H * W)
    s = stats[:, :, 0, :].sum(axis=1).reshape(N, 4, Cout).sum(axis=1)
    sq = stats[:, :, 1, :].sum(axis=1).reshape(N, 4, Cout).sum(axis=1)
    mean = s / cnt
    var = jnp.maximum(sq / cnt - mean * mean, 0.0)     # clamp cancellation noise
    rstd = lax.rsqrt(var + jnp.float32(EPS))
    mu4 = jnp.tile(mean, (1, 4))[:, None, :]           # (N, 1, 4*Cout) per-phase
    rs4 = jnp.tile(rstd, (1, 4))[:, None, :]

    # ---- Pass 2: (recompute conv +) normalize + ReLU, streamed per tile. -------
    out_shape = jax.ShapeDtypeStruct((N, H * W, 4 * Cout), jnp.float32)
    if recompute_conv:
        y_norm = pl.pallas_call(
            functools.partial(_conv_norm_kernel, **kargs),
            out_shape=out_shape,
            grid_spec=pltpu.PrefetchScalarGridSpec(
                num_scalar_prefetch=0, grid=(N, T),
                in_specs=[xp_spec, w_spec, scal_spec, scal_spec],
                out_specs=y_spec),
            compiler_params=cparams,
        )(xp, wmat, mu4, rs4)
    else:
        y_norm = pl.pallas_call(
            _norm_relu_kernel,
            out_shape=out_shape,
            grid_spec=pltpu.PrefetchScalarGridSpec(
                num_scalar_prefetch=0, grid=(N, T),
                in_specs=[y_spec, scal_spec, scal_spec],
                out_specs=y_spec),
            compiler_params=cparams,
        )(y_raw, mu4, rs4)

    # ---- Phase interleave + NCHW in ONE XLA transpose, then channel concat. ----
    # TODO(synk): emitting NHWC (or aliasing into a preallocated concat buffer)
    # from pass 2 would save one more HBM pass but needs an in-kernel lane->sublane
    # de-interleave; kept in XLA where it fuses with the required NCHW transpose.
    y = y_norm.reshape(N, H, W, 2, 2, Cout)                    # (n, h, w, a, b, c)
    y = jnp.transpose(y, (0, 5, 1, 3, 2, 4)).reshape(N, Cout, 2 * H, 2 * W)
    return jnp.concatenate([y, skip_nchw.astype(y.dtype)], axis=1)


# --------------------------------------------------------------------------- #
# Pure-JAX reference + self-test
# --------------------------------------------------------------------------- #
def up_reference(x, skip, weight):
    """ConvTranspose2d as lhs-dilated conv with flipped kernel, then IN + ReLU."""
    rhs = jnp.flip(weight, axis=(2, 3)).transpose(1, 0, 2, 3)        # [Cout,Cin,4,4]
    y = lax.conv_general_dilated(
        x, rhs, window_strides=(1, 1), padding=((2, 2), (2, 2)),
        lhs_dilation=(2, 2), dimension_numbers=("NCHW", "OIHW", "NCHW"))
    mean = jnp.mean(y, axis=(2, 3), keepdims=True)
    var = jnp.mean(jnp.square(y - mean), axis=(2, 3), keepdims=True)
    y = jnp.maximum((y - mean) / jnp.sqrt(var + EPS), 0.0)
    return jnp.concatenate([y, skip], axis=1)


if __name__ == "__main__":
    N, Cin, Cout, H, W = 2, 4, 8, 16, 16
    key = jax.random.PRNGKey(0)
    k1, k2, k3 = jax.random.split(key, 3)
    x = jax.random.normal(k1, (N, Cin, H, W), jnp.float32)
    skip = jax.random.normal(k2, (N, Cout, 2 * H, 2 * W), jnp.float32)
    weight = jax.random.normal(k3, (Cin, Cout, 4, 4), jnp.float32) * 0.1

    ref = np.asarray(up_reference(x, skip, weight))
    fwd = jax.jit(up_forward, static_argnames=(
        "row_tile", "matmul_dtype", "intermediate_dtype", "phase_matmul",
        "recompute_conv"))

    # Exact numerics, multi-tile, recompute-conv path (no y_raw intermediate).
    o1 = jax.block_until_ready(fwd(x, skip, weight, row_tile=8,
                                   matmul_dtype=jnp.float32,
                                   recompute_conv=True, phase_matmul=False))
    np.testing.assert_allclose(np.asarray(o1), ref, rtol=1e-4, atol=1e-4)

    # Exact numerics, materialized intermediate + per-phase (zero-MAC-free) matmuls.
    o2 = jax.block_until_ready(fwd(x, skip, weight, row_tile=8,
                                   matmul_dtype=jnp.float32,
                                   recompute_conv=False, phase_matmul=True))
    np.testing.assert_allclose(np.asarray(o2), ref, rtol=1e-4, atol=1e-4)

    # Default fast path: bf16 MXU operands, auto tile / auto regime selection.
    o3 = jax.block_until_ready(fwd(x, skip, weight))
    np.testing.assert_allclose(np.asarray(o3), ref, rtol=1e-1, atol=1e-1)

    # bf16 operands + materialized bf16 intermediate (large-channel regime path).
    o4 = jax.block_until_ready(fwd(x, skip, weight, recompute_conv=False))
    np.testing.assert_allclose(np.asarray(o4), ref, rtol=1e-1, atol=1e-1)

    assert o1.shape == (N, 2 * Cout, 2 * H, 2 * W)
    print("KERNEL_OK")
</pallas_src>

<mosaic_0001>
module attributes {stable_mosaic.version = 11 : i64} {
  func.func @_stats_kernel(%arg0: i32, %arg1: i32, %arg2: memref<1x18x18x4xf32, #tpu.memory_space<vmem>>, %arg3: memref<36x32xf32, #tpu.memory_space<vmem>>, %arg4: memref<1x1x2x32xf32, #tpu.memory_space<vmem>>) attributes {dimension_semantics = [#tpu.dimension_semantics<parallel>, #tpu.dimension_semantics<parallel>], iteration_bounds = array<i64: 2, 2>, scalar_prefetch = 0 : i64, scratch_operands = 0 : i64, tpu.core_type = #tpu.core_type<tc>, window_params = [{transform_indices = @transform_0, window_bounds = array<i64: 1, 18, 18, 4>}, {pipeline_mode = #tpu.pipeline_mode<synchronous>, transform_indices = @transform_1, window_bounds = array<i64: 36, 32>}, {transform_indices = @transform_2, window_bounds = array<i64: 1, 1, 2, 32>}]} {
    %c8_i32 = arith.constant 8 : i32
    %0 = arith.muli %arg1, %c8_i32 : i32
    %1 = tpu.assume_multiple %0, 8 : i32
    %c0_i32 = arith.constant 0 : i32
    %2 = arith.addi %1, %c0_i32 : i32
    %c0 = arith.constant 0 : index
    %3 = arith.index_cast %2 : i32 to index
    %c0_0 = arith.constant 0 : index
    %c0_1 = arith.constant 0 : index
    %4 = vector.load %arg2[%c0, %3, %c0_0, %c0_1] : memref<1x18x18x4xf32, #tpu.memory_space<vmem>>, vector<1x8x18x4xf32>
    %5 = vector.shape_cast %4 : vector<1x8x18x4xf32> to vector<8x18x4xf32>
    %6 = vector.extract_strided_slice %5 {offsets = [0, 0, 0], sizes = [8, 16, 4], strides = [1, 1, 1]} : vector<8x18x4xf32> to vector<8x16x4xf32>
    %7 = vector.extract_strided_slice %5 {offsets = [0, 1, 0], sizes = [8, 16, 4], strides = [1, 1, 1]} : vector<8x18x4xf32> to vector<8x16x4xf32>
    %8 = vector.extract_strided_slice %5 {offsets = [0, 2, 0], sizes = [8, 16, 4], strides = [1, 1, 1]} : vector<8x18x4xf32> to vector<8x16x4xf32>
    %c1_i32 = arith.constant 1 : i32
    %9 = arith.addi %1, %c1_i32 : i32
    %c0_2 = arith.constant 0 : index
    %10 = arith.index_cast %9 : i32 to index
    %c0_3 = arith.constant 0 : index
    %c0_4 = arith.constant 0 : index
    %11 = vector.load %arg2[%c0_2, %10, %c0_3, %c0_4] : memref<1x18x18x4xf32, #tpu.memory_space<vmem>>, vector<1x8x18x4xf32>
    %12 = vector.shape_cast %11 : vector<1x8x18x4xf32> to vector<8x18x4xf32>
    %13 = vector.extract_strided_slice %12 {offsets = [0, 0, 0], sizes = [8, 16, 4], strides = [1, 1, 1]} : vector<8x18x4xf32> to vector<8x16x4xf32>
    %14 = vector.extract_strided_slice %12 {offsets = [0, 1, 0], sizes = [8, 16, 4], strides = [1, 1, 1]} : vector<8x18x4xf32> to vector<8x16x4xf32>
    %15 = vector.extract_strided_slice %12 {offsets = [0, 2, 0], sizes = [8, 16, 4], strides = [1, 1, 1]} : vector<8x18x4xf32> to vector<8x16x4xf32>
    %c2_i32 = arith.constant 2 : i32
    %16 = arith.addi %1, %c2_i32 : i32
    %c0_5 = arith.constant 0 : index
    %17 = arith.index_cast %16 : i32 to index
    %c0_6 = arith.constant 0 : index
    %c0_7 = arith.constant 0 : index
    %18 = vector.load %arg2[%c0_5, %17, %c0_6, %c0_7] : memref<1x18x18x4xf32, #tpu.memory_space<vmem>>, vector<1x8x18x4xf32>
    %19 = vector.shape_cast %18 : vector<1x8x18x4xf32> to vector<8x18x4xf32>
    %20 = vector.extract_strided_slice %19 {offsets = [0, 0, 0], sizes = [8, 16, 4], strides = [1, 1, 1]} : vector<8x18x4xf32> to vector<8x16x4xf32>
    %21 = vector.extract_strided_slice %19 {offsets = [0, 1, 0], sizes = [8, 16, 4], strides = [1, 1, 1]} : vector<8x18x4xf32> to vector<8x16x4xf32>
    %22 = vector.extract_strided_slice %19 {offsets = [0, 2, 0], sizes = [8, 16, 4], strides = [1, 1, 1]} : vector<8x18x4xf32> to vector<8x16x4xf32>
    %23 = tpu.concatenate %6, %7, %8, %13, %14, %15, %20, %21, %22 in 2 : vector<8x16x4xf32>, vector<8x16x4xf32>, vector<8x16x4xf32>, vector<8x16x4xf32>, vector<8x16x4xf32>, vector<8x16x4xf32>, vector<8x16x4xf32>, vector<8x16x4xf32>, vector<8x16x4xf32> -> vector<8x16x36xf32>
    %24 = vector.shape_cast %23 : vector<8x16x36xf32> to vector<128x36xf32>
    %c0_8 = arith.constant 0 : index
    %c0_9 = arith.constant 0 : index
    %25 = vector.load %arg3[%c0_8, %c0_9] : memref<36x32xf32, #tpu.memory_space<vmem>>, vector<36x32xf32>
    %cst = arith.constant dense<0.000000e+00> : vector<128x32xf32>
    %26 = tpu.matmul %24, %25, %cst {dimension_numbers = #tpu.dot_dimension_numbers<[1], [0], [0], [1], [0, 0, 1, 1], [], []>} : vector<128x36xf32>, vector<36x32xf32>, vector<128x32xf32> -> vector<128x32xf32>
    %cst_10 = arith.constant dense<0.000000e+00> : vector<32xf32>
    %27 = vector.multi_reduction <add>, %26, %cst_10 [0] : vector<128x32xf32> to vector<32xf32>
    %28 = vector.shape_cast %27 : vector<32xf32> to vector<1x32xf32>
    %29 = arith.mulf %26, %26 : vector<128x32xf32>
    %cst_11 = arith.constant dense<0.000000e+00> : vector<32xf32>
    %30 = vector.multi_reduction <add>, %29, %cst_11 [0] : vector<128x32xf32> to vector<32xf32>
    %31 = vector.shape_cast %30 : vector<32xf32> to vector<1x32xf32>
    %32 = tpu.concatenate %28, %31 in 0 : vector<1x32xf32>, vector<1x32xf32> -> vector<2x32xf32>
    %c0_12 = arith.constant 0 : index
    %c0_13 = arith.constant 0 : index
    %c0_14 = arith.constant 0 : index
    %c0_15 = arith.constant 0 : index
    %33 = vector.load %arg4[%c0_12, %c0_13, %c0_14, %c0_15] : memref<1x1x2x32xf32, #tpu.memory_space<vmem>>, vector<1x1x2x32xf32>
    %34 = vector.shape_cast %33 : vector<1x1x2x32xf32> to vector<2x32xf32>
    %35 = vector.shape_cast %32 : vector<2x32xf32> to vector<1x1x2x32xf32>
    tpu.vector_store %arg4[%c0_12, %c0_13, %c0_14, %c0_15], %35 {strides = array<i32>} : memref<1x1x2x32xf32, #tpu.memory_space<vmem>>, vector<1x1x2x32xf32>,
    return
  }
  func.func @transform_0(%arg0: i32, %arg1: i32) -> (i32, i32, i32, i32) {
    %c0_i32 = arith.constant 0 : i32
    %c0_i32_0 = arith.constant 0 : i32
    %c0_i32_1 = arith.constant 0 : i32
    %c0_i32_2 = arith.constant 0 : i32
    return %arg0, %c0_i32, %c0_i32_0, %c0_i32_1 : i32, i32, i32, i32
  }
  func.func @transform_1(%arg0: i32, %arg1: i32) -> (i32, i32) {
    %c0_i32 = arith.constant 0 : i32
    %c0_i32_0 = arith.constant 0 : i32
    %c0_i32_1 = arith.constant 0 : i32
    return %c0_i32, %c0_i32_0 : i32, i32
  }
  func.func @transform_2(%arg0: i32, %arg1: i32) -> (i32, i32, i32, i32) {
    %c0_i32 = arith.constant 0 : i32
    %c0_i32_0 = arith.constant 0 : i32
    %c0_i32_1 = arith.constant 0 : i32
    return %arg0, %arg1, %c0_i32, %c0_i32_0 : i32, i32, i32, i32
  }
}

module attributes {stable_mosaic.version = 11 : i64} {
  func.func @_conv_norm_kernel(%arg0: i32, %arg1: i32, %arg2: memref<1x18x18x4xf32, #tpu.memory_space<vmem>>, %arg3: memref<36x32xf32, #tpu.memory_space<vmem>>, %arg4: memref<1x1x32xf32, #tpu.memory_space<vmem>>, %arg5: memref<1x1x32xf32, #tpu.memory_space<vmem>>, %arg6: memref<1x128x32xf32, #tpu.memory_space<vmem>>) attributes {dimension_semantics = [#tpu.dimension_semantics<parallel>, #tpu.dimension_semantics<parallel>], iteration_bounds = array<i64: 2, 2>, scalar_prefetch = 0 : i64, scratch_operands = 0 : i64, tpu.core_type = #tpu.core_type<tc>, window_params = [{transform_indices = @transform_0, window_bounds = array<i64: 1, 18, 18, 4>}, {pipeline_mode = #tpu.pipeline_mode<synchronous>, transform_indices = @transform_1, window_bounds = array<i64: 36, 32>}, {transform_indices = @transform_2, window_bounds = array<i64: 1, 1, 32>}, {transform_indices = @transform_3, window_bounds = array<i64: 1, 1, 32>}, {transform_indices = @transform_4, window_bounds = array<i64: 1, 128, 32>}]} {
    %c8_i32 = arith.constant 8 : i32
    %0 = arith.muli %arg1, %c8_i32 : i32
    %1 = tpu.assume_multiple %0, 8 : i32
    %c0_i32 = arith.constant 0 : i32
    %2 = arith.addi %1, %c0_i32 : i32
    %c0 = arith.constant 0 : index
    %3 = arith.index_cast %2 : i32 to index
    %c0_0 = arith.constant 0 : index
    %c0_1 = arith.constant 0 : index
    %4 = vector.load %arg2[%c0, %3, %c0_0, %c0_1] : memref<1x18x18x4xf32, #tpu.memory_space<vmem>>, vector<1x8x18x4xf32>
    %5 = vector.shape_cast %4 : vector<1x8x18x4xf32> to vector<8x18x4xf32>
    %6 = vector.extract_strided_slice %5 {offsets = [0, 0, 0], sizes = [8, 16, 4], strides = [1, 1, 1]} : vector<8x18x4xf32> to vector<8x16x4xf32>
    %7 = vector.extract_strided_slice %5 {offsets = [0, 1, 0], sizes = [8, 16, 4], strides = [1, 1, 1]} : vector<8x18x4xf32> to vector<8x16x4xf32>
    %8 = vector.extract_strided_slice %5 {offsets = [0, 2, 0], sizes = [8, 16, 4], strides = [1, 1, 1]} : vector<8x18x4xf32> to vector<8x16x4xf32>
    %c1_i32 = arith.constant 1 : i32
    %9 = arith.addi %1, %c1_i32 : i32
    %c0_2 = arith.constant 0 : index
    %10 = arith.index_cast %9 : i32 to index
    %c0_3 = arith.constant 0 : index
    %c0_4 = arith.constant 0 : index
    %11 = vector.load %arg2[%c0_2, %10, %c0_3, %c0_4] : memref<1x18x18x4xf32, #tpu.memory_space<vmem>>, vector<1x8x18x4xf32>
    %12 = vector.shape_cast %11 : vector<1x8x18x4xf32> to vector<8x18x4xf32>
    %13 = vector.extract_strided_slice %12 {offsets = [0, 0, 0], sizes = [8, 16, 4], strides = [1, 1, 1]} : vector<8x18x4xf32> to vector<8x16x4xf32>
    %14 = vector.extract_strided_slice %12 {offsets = [0, 1, 0], sizes = [8, 16, 4], strides = [1, 1, 1]} : vector<8x18x4xf32> to vector<8x16x4xf32>
    %15 = vector.extract_strided_slice %12 {offsets = [0, 2, 0], sizes = [8, 16, 4], strides = [1, 1, 1]} : vector<8x18x4xf32> to vector<8x16x4xf32>
    %c2_i32 = arith.constant 2 : i32
    %16 = arith.addi %1, %c2_i32 : i32
    %c0_5 = arith.constant 0 : index
    %17 = arith.index_cast %16 : i32 to index
    %c0_6 = arith.constant 0 : index
    %c0_7 = arith.constant 0 : index
    %18 = vector.load %arg2[%c0_5, %17, %c0_6, %c0_7] : memref<1x18x18x4xf32, #tpu.memory_space<vmem>>, vector<1x8x18x4xf32>
    %19 = vector.shape_cast %18 : vector<1x8x18x4xf32> to vector<8x18x4xf32>
    %20 = vector.extract_strided_slice %19 {offsets = [0, 0, 0], sizes = [8, 16, 4], strides = [1, 1, 1]} : vector<8x18x4xf32> to vector<8x16x4xf32>
    %21 = vector.extract_strided_slice %19 {offsets = [0, 1, 0], sizes = [8, 16, 4], strides = [1, 1, 1]} : vector<8x18x4xf32> to vector<8x16x4xf32>
    %22 = vector.extract_strided_slice %19 {offsets = [0, 2, 0], sizes = [8, 16, 4], strides = [1, 1, 1]} : vector<8x18x4xf32> to vector<8x16x4xf32>
    %23 = tpu.concatenate %6, %7, %8, %13, %14, %15, %20, %21, %22 in 2 : vector<8x16x4xf32>, vector<8x16x4xf32>, vector<8x16x4xf32>, vector<8x16x4xf32>, vector<8x16x4xf32>, vector<8x16x4xf32>, vector<8x16x4xf32>, vector<8x16x4xf32>, vector<8x16x4xf32> -> vector<8x16x36xf32>
    %24 = vector.shape_cast %23 : vector<8x16x36xf32> to vector<128x36xf32>
    %c0_8 = arith.constant 0 : index
    %c0_9 = arith.constant 0 : index
    %25 = vector.load %arg3[%c0_8, %c0_9] : memref<36x32xf32, #tpu.memory_space<vmem>>, vector<36x32xf32>
    %cst = arith.constant dense<0.000000e+00> : vector<128x32xf32>
    %26 = tpu.matmul %24, %25, %cst {dimension_numbers = #tpu.dot_dimension_numbers<[1], [0], [0], [1], [0, 0, 1, 1], [], []>} : vector<128x36xf32>, vector<36x32xf32>, vector<128x32xf32> -> vector<128x32xf32>
    %c0_10 = arith.constant 0 : index
    %c0_11 = arith.constant 0 : index
    %c0_12 = arith.constant 0 : index
    %27 = vector.load %arg4[%c0_10, %c0_11, %c0_12] : memref<1x1x32xf32, #tpu.memory_space<vmem>>, vector<1x1x32xf32>
    %28 = vector.shape_cast %27 : vector<1x1x32xf32> to vector<1x32xf32>
    %29 = vector.broadcast %28 : vector<1x32xf32> to vector<128x32xf32>
    %30 = arith.subf %26, %29 : vector<128x32xf32>
    %c0_13 = arith.constant 0 : index
    %c0_14 = arith.constant 0 : index
    %c0_15 = arith.constant 0 : index
    %31 = vector.load %arg5[%c0_13, %c0_14, %c0_15] : memref<1x1x32xf32, #tpu.memory_space<vmem>>, vector<1x1x32xf32>
    %32 = vector.shape_cast %31 : vector<1x1x32xf32> to vector<1x32xf32>
    %33 = vector.broadcast %32 : vector<1x32xf32> to vector<128x32xf32>
    %34 = arith.mulf %30, %33 : vector<128x32xf32>
    %cst_16 = arith.constant 0.000000e+00 : f32
    %35 = vector.broadcast %cst_16 : f32 to vector<128x32xf32>
    %36 = arith.maximumf %34, %35 : vector<128x32xf32>
    %c0_17 = arith.constant 0 : index
    %c0_18 = arith.constant 0 : index
    %c0_19 = arith.constant 0 : index
    %37 = vector.load %arg6[%c0_17, %c0_18, %c0_19] : memref<1x128x32xf32, #tpu.memory_space<vmem>>, vector<1x128x32xf32>
    %38 = vector.shape_cast %37 : vector<1x128x32xf32> to vector<128x32xf32>
    %39 = vector.shape_cast %36 : vector<128x32xf32> to vector<1x128x32xf32>
    tpu.vector_store %arg6[%c0_17, %c0_18, %c0_19], %39 {strides = array<i32>} : memref<1x128x32xf32, #tpu.memory_space<vmem>>, vector<1x128x32xf32>,
    return
  }
  func.func @transform_0(%arg0: i32, %arg1: i32) -> (i32, i32, i32, i32) {
    %c0_i32 = arith.constant 0 : i32
    %c0_i32_0 = arith.constant 0 : i32
    %c0_i32_1 = arith.constant 0 : i32
    %c0_i32_2 = arith.constant 0 : i32
    return %arg0, %c0_i32, %c0_i32_0, %c0_i32_1 : i32, i32, i32, i32
  }
  func.func @transform_1(%arg0: i32, %arg1: i32) -> (i32, i32) {
    %c0_i32 = arith.constant 0 : i32
    %c0_i32_0 = arith.constant 0 : i32
    %c0_i32_1 = arith.constant 0 : i32
    return %c0_i32, %c0_i32_0 : i32, i32
  }
  func.func @transform_2(%arg0: i32, %arg1: i32) -> (i32, i32, i32) {
    %c0_i32 = arith.constant 0 : i32
    %c0_i32_0 = arith.constant 0 : i32
    %c0_i32_1 = arith.constant 0 : i32
    return %arg0, %c0_i32, %c0_i32_0 : i32, i32, i32
  }
  func.func @transform_3(%arg0: i32, %arg1: i32) -> (i32, i32, i32) {
    %c0_i32 = arith.constant 0 : i32
    %c0_i32_0 = arith.constant 0 : i32
    %c0_i32_1 = arith.constant 0 : i32
    return %arg0, %c0_i32, %c0_i32_0 : i32, i32, i32
  }
  func.func @transform_4(%arg0: i32, %arg1: i32) -> (i32, i32, i32) {
    %c0_i32 = arith.constant 0 : i32
    %c0_i32_0 = arith.constant 0 : i32
    return %arg0, %arg1, %c0_i32 : i32, i32, i32
  }
}

</mosaic_0001>

<bundles_post_ra>
// kernel: up_forward.3
= control target key start
LH: loop header
LB: loop body
LE: loop exit
PB: predicated region body
PF: predicated region fallthrough
CT: control target
= control target key end

     0   :  { %s1832_s15 = smov 0   ;;  %s1834_s16 = smov 0   ;;  %s2728_s0 = inlined_call_operand.vmem [shape: f32[2,18,18,4], index: 0, kind: input, shape index: {}]   ;;  %s2729_s1 = inlined_call_operand.vmem [shape: f32[36,32], index: 1, kind: input, shape index: {}]   ;;  %s2730_s2 = inlined_call_operand.vmem [shape: f32[2,1,32], index: 2, kind: input, shape index: {}]   ;;  %s2731_s3 = inlined_call_operand.vmem [shape: f32[2,1,32], index: 3, kind: input, shape index: {}]   ;;  %s2732_s4 = inlined_call_operand.vmem [shape: f32[2,256,32], index: 4, kind: output, shape index: {}]  }
   0x1   :  { %s1836_s17 = smov 0   ;;  %s1838_s18 = smov 0  }
   0x2   :  { %s1840_s19 = smov 0  }
   0x3 LB: > { %s23_s20 = sadd.s32 1, %s1789_s17  ;;  %s26_s21 = sadd.s32 1, %s1793_s18  ;;  %s1797_s19 = sphi %s1840_s19, %s14_s19   ;;  %s1793_s18 = sphi %s1838_s18, %s2748_s18   ;;  %s1789_s17 = sphi %s1836_s17, %s2747_s17   ;;  %s1785_s16 = sphi %s1834_s16, %s2746_s16   ;;  %s1781_s15 = sphi %s1832_s15, %s2745_s15  }
   0x4   : > { %p24_p0 = scmp.ge.s32.totalorder %s23_s20, 2  ;;  %p1561_p1 = scmp.ge.s32.totalorder %s1797_s19, 1 }
   0x5   : > { %p192_p2 = scmp.lt.s32.totalorder %s1797_s19, 5 }
   0x6   : > { %s2750_s20 = smov (%p24_p0, %s23_s20), 0  ;;  %s2752_s21 = smov (!%p24_p0, %s26_s21), %s1793_s18 }
   0x7   : > { %p193_p3 = pnand %p1561_p1, %p192_p2  ;;  %p28_p4 = scmp.ge.s32.totalorder %s2752_s21, 2 }
   0x9   : > { %s2754_s21 = smov (%p28_p4, %s2752_s21), 0  ;;  %196 = sbr.rel (%p193_p3) target bundleno = 616 (0x268), region = 36 }
  0x10   : > { %p228_p5 = scmp.lt.s32.totalorder %s1785_s16, 1  ;;  %s1567_s22 = smul.u32 192, %s1781_s15  ;;  %vm354_vm0 = vcmask 1046528   ;;  %vm443_vm1 = vcmask 1045504   ;;  %vm1218_vm2 = vcmask 1043456   ;;  %vm1028_vm3 = vcmask 31744  }
  0x11   : > { %s1799_s28 = smov 4   ;;  %s1800_s29 = smov 8   ;;  %vm1045_vm4 = vcmask 64512   ;;  %vm1062_vm5 = vcmask 97280   ;;  %vm1079_vm6 = vcmask 130048   ;;  %vm1096_vm7 = vcmask 162816  }
  0x12   : > { %s2756_s16 = smov (!%p228_p5, %s1785_s16), 1  ;;  %s1801_s30 = smov 12   ;;  %vm1113_vm8 = vcmask 195584   ;;  %vm1130_vm9 = vcmask 228352   ;;  %vm1147_vm10 = vcmask 261120   ;;  %vm1169_vm11 = vcmask 293888  }
  0x13   : > { %s1710_s23 = smul.u32 432, %s2756_s16  ;;  %s1802_s5 = smov 16  }
  0x14   : > { %s1803_s6 = smov 20   ;;  %s1804_s7 = smov 24  }
  0x15   : > { %s232_s26 = scalar_lea.vmem %s2728_s0, %s1710_s23  ;;  %s1805_s8 = smov 28  }
  0x16   : > { %s1871_s27 = scalar_lea.vmem %s232_s26, %s1567_s22  ;;  %s1806_s24 = smov 32  }
  0x17   : > { %v1874_v0 = vld [vmem:[%s1871_s27 + $0x8] sm:$0xff]  ;;  %v254_v1 = vld [vmem:[%s1871_s27 + $0x10] sm:$0x3]  ;;  %v1878_v2 = vld [vmem:[%s1871_s27] sm:$0xff] }
  0x18   : > { %v356_v3 = vrot.slane %v1874_v0, 1  ;;  %v358_v4 = vrot.slane %v254_v1, 1  ;;  %v355_v5 = vrot.slane %v1878_v2, 1  ;;  %v1883_v6 = vld [vmem:[%s1871_s27 + $0x68] sm:$0xff]  ;;  %v266_v7 = vld [vmem:[%s1871_s27 + $0x70] sm:$0x3] }
  0x19   : > { %v1887_v8 = vrot.slane %v1883_v6, 1  ;;  %v378_v9 = vrot.slane %v266_v7, 1  ;;  %v1890_v10 = vld [vmem:[%s1871_s27 + $0x60] sm:$0xff]  ;;  %v1898_v14 = vrot.slane %v1883_v6, 2  ;;  %v444_v15 = vrot.slane %v1878_v2, 2  ;;  %v1926_v26 = vld [vmem:[%s1871_s27 + $0x78] sm:$0xff] }
  0x1a   : > { %v359_v11 = vsel %vm354_vm0, %v356_v3, %v358_v4  ;;  %v357_v12 = vsel %vm354_vm0, %v355_v5, %v356_v3  ;;  %v375_v13 = vrot.slane %v1890_v10, 1  ;;  %v464_v18 = vrot.slane %v1890_v10, 2  ;;  %v1929_v27 = vld [vmem:[%s1871_s27 + $0x18] sm:$0xff]  ;;  %v1932_v28 = vld [vmem:[%s1871_s27 + $0x80] sm:$0xff]  ;;  %v1584_v36 = vld [vmem:[%s1871_s27 + $0x88] sm:$0x3] }
  0x1b   : > { %397 = vrot.lane.b32.xlu1 %v359_v11, %s1799_s28  ;;  %395 = vrot.lane.b32.xlu0 %v357_v12, %s1799_s28  ;;  %v379_v16 = vsel %vm354_vm0, %v1887_v8, %v378_v9  ;;  %v445_v19 = vrot.slane %v1874_v0, 2  ;;  %v467_v22 = vrot.slane %v266_v7, 2  ;;  %v447_v23 = vrot.slane %v254_v1, 2  ;;  %v1935_v29 = vld [vmem:[%s1871_s27 + $0x20] sm:$0xff]  ;;  %v1572_v37 = vld [vmem:[%s1871_s27 + $0x28] sm:$0x3] }
  0x1c   : > { %v1905_v17 = vsel %vm354_vm0, %v375_v13, %v1887_v8  ;;  %v1914_v20 = vsel %vm443_vm1, %v464_v18, %v1898_v14  ;;  %v624_v30 = vrot.slane %v1926_v26, 1  ;;  %v604_v31 = vrot.slane %v1929_v27, 1  ;;  %v269_v46 = vld [vmem:[%s1871_s27 + $0x88] sm:$0x3]  ;;  %v1982_v58 = vld [vmem:[%s1871_s27 + $0x90] sm:$0xff]  ;;  %v1996_v1 = vld [vmem:[%s1871_s27 + $0x98] sm:$0xff] }
  0x1d   : > { %v446_v21 = vsel %vm443_vm1, %v444_v15, %v445_v19  ;;  %v468_v24 = vsel %vm443_vm1, %v1898_v14, %v467_v22  ;;  %v448_v25 = vsel %vm443_vm1, %v445_v19, %v447_v23  ;;  %v625_v32 = vrot.slane %v1932_v28, 1  ;;  %v257_v47 = vld [vmem:[%s1871_s27 + $0x28] sm:$0x3]  ;;  %v1985_v59 = vld [vmem:[%s1871_s27 + $0x30] sm:$0xff]  ;;  %v1999_v3 = vld [vmem:[%s1871_s27 + $0x38] sm:$0xff] }
  0x1e   : > { %v605_v33 = vrot.slane %v1935_v29, 1  ;;  %v627_v38 = vrot.slane %v1584_v36, 1  ;;  %v607_v39 = vrot.slane %v1572_v37, 1  ;;  %v712_v40 = vrot.slane %v1926_v26, 2  ;;  %v1610_v13 = vld [vmem:[%s1871_s27 + $0xa0] sm:$0x3] }
  0x1f   : > { %413 = vrot.lane.b32.xlu1 %v379_v16, %s1799_s28  ;;  %411 = vrot.lane.b32.xlu0 %v1905_v17, %s1799_s28  ;;  %v626_v34 = vsel %vm354_vm0, %v624_v30, %v625_v32  ;;  %v692_v41 = vrot.slane %v1929_v27, 2  ;;  %v713_v42 = vrot.slane %v1932_v28, 2  ;;  %v693_v43 = vrot.slane %v1935_v29, 2  ;;  %v1598_v15 = vld [vmem:[%s1871_s27 + $0x40] sm:$0x3] }
  0x20   : > { %v606_v35 = vsel %vm354_vm0, %v604_v31, %v605_v33  ;;  %v628_v44 = vsel %vm354_vm0, %v625_v32, %v627_v38  ;;  %v608_v45 = vsel %vm354_vm0, %v605_v33, %v607_v39  ;;  %v383_v50 = vrot.slane %v269_v46, 1  ;;  %v1164_v23 = vld [vmem:[%s2729_s1] sm:$0xff] }
  0x21   : > { %v714_v48 = vsel %vm443_vm1, %v712_v40, %v713_v42  ;;  %v694_v49 = vsel %vm443_vm1, %v692_v41, %v693_v43  ;;  %v363_v51 = vrot.slane %v257_v47, 1  ;;  %v715_v54 = vrot.slane %v1584_v36, 2  ;;  %v1587_v38 = vld [vmem:[%s1871_s27 + $0xa0] sm:$0x3] }
  0x22   : > { %v384_v52 = vsel %vm354_vm0, %v625_v32, %v383_v50  ;;  %v695_v55 = vrot.slane %v1572_v37, 2  ;;  %v472_v60 = vrot.slane %v269_v46, 2  ;;  %v452_v61 = vrot.slane %v257_v47, 2  ;;  %v1575_v39 = vld [vmem:[%s1871_s27 + $0x40] sm:$0x3] }
  0x23   : > { %500 = vrot.lane.b32.xlu1 %v1914_v20, %s1800_s29  ;;  %484 = vrot.lane.b32.xlu0 %v446_v21, %s1800_s29  ;;  %v364_v53 = vsel %vm354_vm0, %v605_v33, %v363_v51  ;;  %v716_v56 = vsel %vm443_vm1, %v713_v42, %v715_v54  ;;  %v872_v4 = vrot.slane %v1982_v58, 1  ;;  %v852_v5 = vrot.slane %v1985_v59, 1  ;;  %v1166_v33 = vld [vmem:[%s2729_s1 + $0x10] sm:$0xff]  ;;  %v272_v47 = vld [vmem:[%s1871_s27 + $0xa0] sm:$0x3] }
  0x24   : > { %v696_v57 = vsel %vm443_vm1, %v693_v43, %v695_v55  ;;  %v473_v62 = vsel %vm443_vm1, %v713_v42, %v472_v60  ;;  %v453_v63 = vsel %vm443_vm1, %v693_v43, %v452_v61  ;;  %v2008_v7 = vrot.slane %v1996_v1, 1  ;;  %v1168_v42 = vld [vmem:[%s2729_s1 + $0x20] sm:$0xf]  ;;  %v2101_v61 = vld [vmem:[%s1871_s27 + $0xa8] sm:$0xff] }
  0x25   : > { %v2011_v9 = vrot.slane %v1999_v3, 1  ;;  %v875_v16 = vrot.slane %v1610_v13, 1  ;;  %v855_v18 = vrot.slane %v1598_v15, 1  ;;  %v960_v19 = vrot.slane %v1982_v58, 2  ;;  %2737 = vst [vmem:[#allocation2_spill] sm:$0xff] %v2101_v61 }
  0x26   : > { %v874_v11 = vsel %vm354_vm0, %v872_v4, %v2008_v7  ;;  %v940_v21 = vrot.slane %v1985_v59, 2  ;;  %v2032_v22 = vrot.slane %v1996_v1, 2  ;;  %v632_v40 = vrot.slane %v1587_v38, 1 }
  0x27   : > { %502 = vrot.lane.b32.xlu1 %v468_v24, %s1800_s29  ;;  %486 = vrot.lane.b32.xlu0 %v448_v25, %s1800_s29  ;;  %v854_v12 = vsel %vm354_vm0, %v852_v5, %v2011_v9  ;;  %v1165_v24 = vld [vmem:[%s2729_s1 + $0x8] sm:$0xff]  ;;  %v2043_v25 = vrot.slane %v1999_v3, 2  ;;  %v876_v30 = vsel %vm354_vm0, %v2008_v7, %v875_v16  ;;  %v856_v31 = vsel %vm354_vm0, %v2011_v9, %v855_v18  ;;  %v2129_v18 = vld [vmem:[%s1871_s27 + $0xb0] sm:$0xff] }
  0x28   : > { %v1696_v32 = vpack.c.bf16 %v1165_v24, %v1164_v23  ;;  %v612_v41 = vrot.slane %v1575_v39, 1  ;;  %v633_v43 = vsel %vm354_vm0, %v2008_v7, %v632_v40  ;;  %v943_v46 = vrot.slane %v1598_v15, 2  ;;  %2739 = vst [vmem:[#allocation4_spill] sm:$0xff] %v2129_v18 }
  0x29   : > { %v942_v36 = vsel %vm443_vm1, %v940_v21, %v2043_v25  ;;  %v388_v51 = vrot.slane %v272_v47, 1  ;;  %v720_v55 = vrot.slane %v1587_v38, 2  ;;  %v877_v21 = vrot.slane %v2101_v61, 1  ;;  %v1601_v38 = vld [vmem:[%s1871_s27 + $0x58] sm:$0x3] }
  0x2a   : > { %1697 = vmatprep.subr.bf16.mxu0 %v1696_v32  ;;  %1704 = vmatprep.subr.bf16.mxu1 %v1696_v32  ;;  %v944_v50 = vsel %vm443_vm1, %v2043_v25, %v943_v46  ;;  %v2141_v23 = vrot.slane %v2129_v18, 1  ;;  %v860_v40 = vrot.slane %v1601_v38, 1 }
  0x2b   : > { %564 = vrot.lane.b32.xlu1 %v1926_v26, %s1801_s30  ;;  %548 = vrot.lane.b32.xlu0 %v1929_v27, %s1801_s30 }
  0x2c   : > { %1699 = vmatpush3.bf16.msra.mxu0 %v1696_v32  ;;  %1707 = vmatpush3.bf16.msra.mxu1 %v1696_v32 }
  0x2f   : > { %566 = vrot.lane.b32.xlu1 %v1932_v28, %s1801_s30  ;;  %550 = vrot.lane.b32.xlu0 %v1935_v29, %s1801_s30 }
  0x33   : > { %660 = vrot.lane.b32.xlu1 %v626_v34, %s1802_s5  ;;  %644 = vrot.lane.b32.xlu0 %v606_v35, %s1802_s5 }
  0x37   : > { %415 = vrot.lane.b32.xlu1 %v626_v34, %s1799_s28  ;;  %399 = vrot.lane.b32.xlu0 %v606_v35, %s1799_s28  ;;  %v1167_v34 = vld [vmem:[%s2729_s1 + $0x18] sm:$0xff]  ;;  %v962_v35 = vsel %vm443_vm1, %v960_v19, %v2032_v22  ;;  %v2132_v19 = vld [vmem:[%s1871_s27 + $0x50] sm:$0xff] }
  0x38   : > { %v1700_v37 = vpack.c.bf16 %v1167_v34, %v1166_v33  ;;  %2740 = vst [vmem:[#allocation5_spill] sm:$0xff] %v2132_v19  ;;  %v2144_v24 = vrot.slane %v2132_v19, 1  ;;  %v2186_v46 = vrot.slane %v2132_v19, 2 }
  0x3a   : > { %1701 = vmatprep.subr.bf16.mxu0 %v1700_v37  ;;  %1705 = vmatprep.subr.bf16.mxu1 %v1700_v37 }
  0x3b   : > { %662 = vrot.lane.b32.xlu1 %v628_v44, %s1802_s5  ;;  %646 = vrot.lane.b32.xlu0 %v608_v45, %s1802_s5  ;;  %v613_v44 = vsel %vm354_vm0, %v2011_v9, %v612_v41  ;;  %v963_v45 = vrot.slane %v1610_v13, 2 }
  0x3c   : > { %1703 = vmatpush3.bf16.msra.mxu0 %v1700_v37  ;;  %1708 = vmatpush3.bf16.msra.mxu1 %v1700_v37  ;;  %v1613_v37 = vld [vmem:[%s1871_s27 + $0xb8] sm:$0x3] }
  0x3d   : > { %1670 = vmatprep.subr.msk.mxu0 %vm1218_vm2, %v1168_v42  ;;  %1706 = vmatprep.subr.msk.mxu1 %vm1218_vm2, %v1168_v42 }
  0x3f   : > { %748 = vrot.lane.b32.xlu1 %v714_v48, %s1803_s6  ;;  %732 = vrot.lane.b32.xlu0 %v694_v49, %s1803_s6 }
  0x40   : > { %1671 = vmatpush3.msk.msra.mxu0 %vm1218_vm2, %v1168_v42  ;;  %1709 = vmatpush3.msk.msra.mxu1 %vm1218_vm2, %v1168_v42 }
  0x43   : > { %417 = vrot.lane.b32.xlu1 %v384_v52, %s1799_s28  ;;  %401 = vrot.lane.b32.xlu0 %v364_v53, %s1799_s28  ;;  %v389_v53 = vsel %vm354_vm0, %v2008_v7, %v388_v51 }
  0x47   : > { %504 = vrot.lane.b32.xlu1 %v714_v48, %s1800_s29  ;;  %488 = vrot.lane.b32.xlu0 %v694_v49, %s1800_s29  ;;  %v260_v48 = vld [vmem:[%s1871_s27 + $0x40] sm:$0x3]  ;;  %v964_v49 = vsel %vm443_vm1, %v2032_v22, %v963_v45  ;;  %v2183_v45 = vrot.slane %v2129_v18, 2 }
  0x48   : > { %v368_v52 = vrot.slane %v260_v48, 1  ;;  %v457_v4 = vrot.slane %v260_v48, 2  ;;  %v861_v48 = vsel %vm354_vm0, %v2144_v24, %v860_v40  ;;  %v948_v40 = vrot.slane %v1601_v38, 2 }
  0x4a   : > { %v369_v54 = vsel %vm354_vm0, %v2011_v9, %v368_v52 }
  0x4b   : > { %750 = vrot.lane.b32.xlu1 %v716_v56, %s1803_s6  ;;  %734 = vrot.lane.b32.xlu0 %v696_v57, %s1803_s6  ;;  %v700_v56 = vrot.slane %v1575_v39, 2  ;;  %v721_v57 = vsel %vm443_vm1, %v2032_v22, %v720_v55  ;;  %v880_v39 = vrot.slane %v1613_v37, 1  ;;  %v1590_v55 = vld [vmem:[%s1871_s27 + $0xb8] sm:$0x3] }
  0x4d   : > { %v701_v60 = vsel %vm443_vm1, %v2043_v25, %v700_v56  ;;  %v1578_v56 = vld [vmem:[%s1871_s27 + $0x58] sm:$0x3] }
  0x4f   : > { %812 = vrot.lane.b32.xlu1 %v1982_v58, %s1804_s7  ;;  %796 = vrot.lane.b32.xlu0 %v1985_v59, %s1804_s7 }
  0x53   : > { %506 = vrot.lane.b32.xlu1 %v473_v62, %s1800_s29  ;;  %490 = vrot.lane.b32.xlu0 %v453_v63, %s1800_s29  ;;  %v2104_v62 = vld [vmem:[%s1871_s27 + $0x48] sm:$0xff]  ;;  %v477_v63 = vrot.slane %v272_v47, 2  ;;  %v881_v47 = vsel %vm354_vm0, %v2141_v23, %v880_v39  ;;  %v968_v39 = vrot.slane %v1613_v37, 2 }
  0x54   : > { %2738 = vst [vmem:[#allocation3_spill] sm:$0xff] %v2104_v62 }
  0x55   : > { %v478_v9 = vsel %vm443_vm1, %v2032_v22, %v477_v63  ;;  %v857_v22 = vrot.slane %v2104_v62, 1 }
  0x57   : > { %568 = vrot.lane.b32.xlu1 %v1982_v58, %s1801_s30  ;;  %552 = vrot.lane.b32.xlu0 %v1985_v59, %s1801_s30  ;;  %v859_v32 = vsel %vm354_vm0, %v857_v22, %v2144_v24 }
  0x5b   : > { %814 = vrot.lane.b32.xlu1 %v1996_v1, %s1804_s7  ;;  %798 = vrot.lane.b32.xlu0 %v1999_v3, %s1804_s7 }
  0x5f   : > { %908 = vrot.lane.b32.xlu1 %v874_v11, %s1805_s8  ;;  %892 = vrot.lane.b32.xlu0 %v854_v12, %s1805_s8 }
  0x63   : > { %570 = vrot.lane.b32.xlu1 %v1996_v1, %s1801_s30  ;;  %554 = vrot.lane.b32.xlu0 %v1999_v3, %s1801_s30 }
  0x67   : > { %664 = vrot.lane.b32.xlu1 %v874_v11, %s1802_s5  ;;  %648 = vrot.lane.b32.xlu0 %v854_v12, %s1802_s5 }
  0x6b   : > { %910 = vrot.lane.b32.xlu1 %v876_v30, %s1805_s8  ;;  %894 = vrot.lane.b32.xlu0 %v856_v31, %s1805_s8  ;;  %v879_v31 = vsel %vm354_vm0, %v877_v21, %v2141_v23 }
  0x6f   : > { %996 = vrot.lane.b32.xlu1 %v962_v35, %s1806_s24  ;;  %980 = vrot.lane.b32.xlu0 %v942_v36, %s1806_s24 }
  0x73   : > { %419 = vrot.lane.b32.xlu1 %v874_v11, %s1799_s28  ;;  %403 = vrot.lane.b32.xlu0 %v854_v12, %s1799_s28  ;;  %v458_v11 = vsel %vm443_vm1, %v2043_v25, %v457_v4 }
  0x77   : > { %666 = vrot.lane.b32.xlu1 %v633_v43, %s1802_s5  ;;  %650 = vrot.lane.b32.xlu0 %v613_v44, %s1802_s5  ;;  %v965_v43 = vrot.slane %v2101_v61, 2  ;;  %v945_v44 = vrot.slane %v2104_v62, 2 }
  0x79   : > { %v967_v51 = vsel %vm443_vm1, %v965_v43, %v2183_v45  ;;  %v947_v52 = vsel %vm443_vm1, %v945_v44, %v2186_v46  ;;  %v275_v44 = vld [vmem:[%s1871_s27 + $0xb8] sm:$0x3] }
  0x7b   : > { %752 = vrot.lane.b32.xlu1 %v962_v35, %s1803_s6  ;;  %736 = vrot.lane.b32.xlu0 %v942_v36, %s1803_s6 }
  0x7f   : > { %998 = vrot.lane.b32.xlu1 %v964_v49, %s1806_s24  ;;  %982 = vrot.lane.b32.xlu0 %v944_v50, %s1806_s24 }
  0x83   : > { %421 = vrot.lane.b32.xlu1 %v389_v53, %s1799_s28  ;;  %405 = vrot.lane.b32.xlu0 %v369_v54, %s1799_s28 }
  0x87   : > { %508 = vrot.lane.b32.xlu1 %v962_v35, %s1800_s29  ;;  %492 = vrot.lane.b32.xlu0 %v942_v36, %s1800_s29 }
  0x8b   : > { %754 = vrot.lane.b32.xlu1 %v721_v57, %s1803_s6  ;;  %738 = vrot.lane.b32.xlu0 %v701_v60, %s1803_s6  ;;  %v637_v57 = vrot.slane %v1590_v55, 1  ;;  %v617_v60 = vrot.slane %v1578_v56, 1 }
  0x8d   : > { %v2106_v5 = vpop.permute.xlu1 %397  ;;  %v2108_v7 = vpop.permute.xlu0 %395 }
  0x8f   : > { %816 = vrot.lane.b32.xlu1 %v2101_v61, %s1804_s7  ;;  %800 = vrot.lane.b32.xlu0 %v2104_v62, %s1804_s7 }
  0x91   : > { %v2118_v12 = vpop.permute.xlu1 %413  ;;  %v2120_v13 = vpop.permute.xlu0 %411 }
  0x93   : > { %510 = vrot.lane.b32.xlu1 %v478_v9, %s1800_s29  ;;  %494 = vrot.lane.b32.xlu0 %v458_v11, %s1800_s29  ;;  %v638_v9 = vsel %vm354_vm0, %v2141_v23, %v637_v57  ;;  %v618_v11 = vsel %vm354_vm0, %v2144_v24, %v617_v60  ;;  %v393_v57 = vrot.slane %v275_v44, 1 }
  0x95   : > { %v2124_v15 = vpop.permute.xlu1 %500  ;;  %v2126_v16 = vpop.permute.xlu0 %484  ;;  %v394_v38 = vsel %vm354_vm0, %v2141_v23, %v393_v57 }
  0x97   : > { %572 = vrot.lane.b32.xlu1 %v2101_v61, %s1801_s30  ;;  %556 = vrot.lane.b32.xlu0 %v2104_v62, %s1801_s30 }
  0x99   : > { %v2146_v25 = vpop.permute.xlu1 %502  ;;  %v2148_v30 = vpop.permute.xlu0 %486 }
  0x9b   : > { %818 = vrot.lane.b32.xlu1 %v2129_v18, %s1804_s7  ;;  %802 = vrot.lane.b32.xlu0 %v2132_v19, %s1804_s7 }
  0x9d   : > { %v2158_v33 = vpop.permute.xlu1 %564  ;;  %v2160_v34 = vpop.permute.xlu0 %548 }
  0x9f   : > { %912 = vrot.lane.b32.xlu1 %v879_v31, %s1805_s8  ;;  %896 = vrot.lane.b32.xlu0 %v859_v32, %s1805_s8 }
  0xa1   : > { %v2164_v35 = vpop.permute.xlu1 %566  ;;  %v2166_v36 = vpop.permute.xlu0 %550 }
  0xa3   : > { %574 = vrot.lane.b32.xlu1 %v2129_v18, %s1801_s30  ;;  %558 = vrot.lane.b32.xlu0 %v2132_v19, %s1801_s30  ;;  %v725_v19 = vrot.slane %v1590_v55, 2  ;;  %v705_v18 = vrot.slane %v1578_v56, 2  ;;  %v2263_v55 = vld [vmem:[%s1871_s27 + $0xc0] sm:$0xff]  ;;  %v482_v56 = vrot.slane %v275_v44, 2 }
  0xa5   : > { %v2174_v41 = vpop.permute.xlu1 %660  ;;  %v2176_v42 = vpop.permute.xlu0 %644  ;;  %v726_v23 = vsel %vm443_vm1, %v2183_v45, %v725_v19 }
  0xa7   : > { %668 = vrot.lane.b32.xlu1 %v879_v31, %s1802_s5  ;;  %652 = vrot.lane.b32.xlu0 %v859_v32, %s1802_s5 }
  0xa9   : > { %v2192_v49 = vpop.permute.xlu1 %415  ;;  %v2194_v50 = vpop.permute.xlu0 %399 }
  0xab   : > { %914 = vrot.lane.b32.xlu1 %v881_v47, %s1805_s8  ;;  %898 = vrot.lane.b32.xlu0 %v861_v48, %s1805_s8  ;;  %v969_v47 = vsel %vm443_vm1, %v2183_v45, %v968_v39  ;;  %v949_v48 = vsel %vm443_vm1, %v2186_v46, %v948_v40 }
  0xad   : > { %v2202_v53 = vpop.permute.xlu1 %662  ;;  %v2204_v54 = vpop.permute.xlu0 %646 }
  0xaf   : > { %1000 = vrot.lane.b32.xlu1 %v967_v51, %s1806_s24  ;;  %984 = vrot.lane.b32.xlu0 %v947_v52, %s1806_s24 }
  0xb1   : > { %v2210_v63 = vpop.permute.xlu1 %748  ;;  %v2212_v4 = vpop.permute.xlu0 %732 }
  0xb3   : > { %423 = vrot.lane.b32.xlu1 %v879_v31, %s1799_s28  ;;  %407 = vrot.lane.b32.xlu0 %v859_v32, %s1799_s28  ;;  %v263_v32 = vld [vmem:[%s1871_s27 + $0x58] sm:$0x3] }
  0xb4   : > { %v373_v60 = vrot.slane %v263_v32, 1 }
  0xb5   : > { %v2220_v21 = vpop.permute.xlu1 %417  ;;  %v2222_v22 = vpop.permute.xlu0 %401 }
  0xb7   : > { %670 = vrot.lane.b32.xlu1 %v638_v9, %s1802_s5  ;;  %654 = vrot.lane.b32.xlu0 %v618_v11, %s1802_s5  ;;  %v374_v11 = vsel %vm354_vm0, %v2144_v24, %v373_v60  ;;  %v706_v24 = vsel %vm443_vm1, %v2186_v46, %v705_v18  ;;  %v483_v18 = vsel %vm443_vm1, %v2183_v45, %v482_v56 }
  0xb8   : > { %v1039_v45 = vsel %vm1028_vm3, %v1926_v26, %v2192_v49 }
  0xb9   : > { %v505_v43 = vpop.permute.xlu1 %504  ;;  %v489_v31 = vpop.permute.xlu0 %488 }
  0xba   : > { %v1056_v56 = vsel %vm1045_vm4, %v1039_v45, %v505_v43  ;;  %v1029_v43 = vsel %vm1028_vm3, %v1878_v2, %v2108_v7 }
  0xbb   : > { %756 = vrot.lane.b32.xlu1 %v967_v51, %s1803_s6  ;;  %740 = vrot.lane.b32.xlu0 %v947_v52, %s1803_s6 }
  0xbd   : > { %v2234_v9 = vpop.permute.xlu1 %750  ;;  %v2236_v37 = vpop.permute.xlu0 %734 }
  0xbf   : > { %1002 = vrot.lane.b32.xlu1 %v969_v47, %s1806_s24  ;;  %986 = vrot.lane.b32.xlu0 %v949_v48, %s1806_s24 }
  0xc1   : > { %v2244_v39 = vpop.permute.xlu1 %812  ;;  %v2246_v40 = vpop.permute.xlu0 %796 }
  0xc3   : > { %425 = vrot.lane.b32.xlu1 %v394_v38, %s1799_s28  ;;  %409 = vrot.lane.b32.xlu0 %v374_v11, %s1799_s28  ;;  %v462_v38 = vrot.slane %v263_v32, 2 }
  0xc5   : > { %v2250_v47 = vpop.permute.xlu1 %506  ;;  %v2252_v48 = vpop.permute.xlu0 %490  ;;  %v463_v19 = vsel %vm443_vm1, %v2186_v46, %v462_v38  ;;  %v1031_v46 = vsel %vm1028_vm3, %v1929_v27, %v2194_v50 }
  0xc6   : > { %v1048_v38 = vsel %vm1045_vm4, %v1031_v46, %v489_v31  ;;  %v1037_v31 = vsel %vm1028_vm3, %v1890_v10, %v2120_v13 }
  0xc7   : > { %512 = vrot.lane.b32.xlu1 %v967_v51, %s1800_s29  ;;  %496 = vrot.lane.b32.xlu0 %v947_v52, %s1800_s29 }
  0xc9   : > { %v569_v57 = vpop.permute.xlu1 %568  ;;  %v553_v60 = vpop.permute.xlu0 %552 }
  0xca   : > { %v1073_v26 = vsel %vm1062_vm5, %v1056_v56, %v569_v57  ;;  %v1065_v27 = vsel %vm1062_vm5, %v1048_v38, %v553_v60  ;;  %v1054_v57 = vsel %vm1045_vm4, %v1037_v31, %v2124_v15  ;;  %v1046_v60 = vsel %vm1045_vm4, %v1029_v43, %v2126_v16 }
  0xcb   : > { %758 = vrot.lane.b32.xlu1 %v726_v23, %s1803_s6  ;;  %742 = vrot.lane.b32.xlu0 %v706_v24, %s1803_s6  ;;  %v2284_v24 = vld [vmem:[%s1871_s27 + $0xc8] sm:$0xff]  ;;  %v1071_v7 = vsel %vm1062_vm5, %v1054_v57, %v2158_v33  ;;  %v970_v43 = vrot.slane %v2263_v55, 2 }
  0xcc   : > { %v1088_v15 = vsel %vm1079_vm6, %v1071_v7, %v2174_v41 }
  0xcd   : > { %v2265_v51 = vpop.permute.xlu1 %814  ;;  %v2267_v52 = vpop.permute.xlu0 %798  ;;  %v1105_v33 = vsel %vm1096_vm7, %v1088_v15, %v2210_v63 }
  0xce   : > { %v1122_v41 = vsel %vm1113_vm8, %v1105_v33, %v2244_v39 }
  0xcf   : > { %820 = vrot.lane.b32.xlu1 %v2263_v55, %s1804_s7  ;;  %804 = vrot.lane.b32.xlu0 %v1890_v10, %s1804_s7 }
  0xd1   : > { %v909_v11 = vpop.permute.xlu1 %908  ;;  %v893_v23 = vpop.permute.xlu0 %892 }
  0xd2   : > { %v1139_v46 = vsel %vm1130_vm9, %v1122_v41, %v909_v11 }
  0xd3   : > { %514 = vrot.lane.b32.xlu1 %v483_v18, %s1800_s29  ;;  %498 = vrot.lane.b32.xlu0 %v463_v19, %s1800_s29  ;;  %v882_v18 = vrot.slane %v2263_v55, 1  ;;  %v2300_v19 = vrot.slane %v2284_v24, 1 }
  0xd5   : > { %v2279_v44 = vpop.permute.xlu1 %570  ;;  %v2281_v32 = vpop.permute.xlu0 %554  ;;  %v884_v2 = vsel %vm354_vm0, %v882_v18, %v2300_v19 }
  0xd7   : > { %576 = vrot.lane.b32.xlu1 %v2263_v55, %s1801_s30  ;;  %560 = vrot.lane.b32.xlu0 %v1890_v10, %s1801_s30  ;;  %v1063_v10 = vsel %vm1062_vm5, %v1046_v60, %v2160_v34  ;;  %v2384_v60 = vrot.slane %v2284_v24, 2  ;;  %v1593_v55 = vld [vmem:[%s1871_s27 + $0xd0] sm:$0x3] }
  0xd8   : > { %v1080_v16 = vsel %vm1079_vm6, %v1063_v10, %v2176_v42 }
  0xd9   : > { %v665_v49 = vpop.permute.xlu1 %664  ;;  %v649_v50 = vpop.permute.xlu0 %648  ;;  %v1097_v34 = vsel %vm1096_vm7, %v1080_v16, %v2212_v4  ;;  %v2352_v4 = vld [vmem:[%s1871_s27 + $0xd0] sm:$0x3]  ;;  %v972_v15 = vsel %vm443_vm1, %v970_v43, %v2384_v60  ;;  %v642_v16 = vrot.slane %v1593_v55, 1 }
  0xda   : > { %v2305_v62 = vsel %vm1079_vm6, %v1073_v26, %v665_v49  ;;  %v2308_v61 = vsel %vm1079_vm6, %v1065_v27, %v649_v50  ;;  %v1114_v42 = vsel %vm1113_vm8, %v1097_v34, %v2246_v40  ;;  %v2357_v27 = vld [vmem:[%s1871_s27 + $0x70] sm:$0x3]  ;;  %v885_v39 = vrot.slane %v2352_v4, 1 }
  0xdb   : > { %822 = vrot.lane.b32.xlu1 %v2284_v24, %s1804_s7  ;;  %806 = vrot.lane.b32.xlu0 %v1883_v6, %s1804_s7  ;;  %v1131_v63 = vsel %vm1130_vm9, %v1114_v42, %v893_v23  ;;  %v865_v23 = vrot.slane %v2357_v27, 1  ;;  %v1040_v49 = vsel %vm1028_vm3, %v1932_v28, %v2220_v21  ;;  %v1032_v50 = vsel %vm1028_vm3, %v1935_v29, %v2222_v22 }
  0xdc   : > { %v1057_v31 = vsel %vm1045_vm4, %v1040_v49, %v2250_v47  ;;  %v1049_v57 = vsel %vm1045_vm4, %v1032_v50, %v2252_v48  ;;  %v886_v28 = vsel %vm354_vm0, %v2300_v19, %v885_v39  ;;  %v1617_v49 = vld [vmem:[%s1871_s27 + $0xd8] sm:$0xff] }
  0xdd   : > { %v2330_v13 = vpop.permute.xlu1 %910  ;;  %v2332_v45 = vpop.permute.xlu0 %894  ;;  %v1074_v29 = vsel %vm1062_vm5, %v1057_v31, %v2279_v44  ;;  %v1066_v21 = vsel %vm1062_vm5, %v1049_v57, %v2281_v32  ;;  %v866_v48 = vsel %vm354_vm0, %v1887_v8, %v865_v23  ;;  %v1030_v44 = vsel %vm1028_vm3, %v1874_v0, %v2106_v5  ;;  %v1605_v31 = vld [vmem:[%s1871_s27 + $0x78] sm:$0xff]  ;;  %v1618_v57 = vld [vmem:[%s1871_s27 + $0xe0] sm:$0xff] }
  0xde   : > { %v1038_v32 = vsel %vm1028_vm3, %v1883_v6, %v2118_v12  ;;  %v1047_v10 = vsel %vm1045_vm4, %v1030_v44, %v2148_v30 }
  0xdf   : > { %916 = vrot.lane.b32.xlu1 %v884_v2, %s1805_s8  ;;  %900 = vrot.lane.b32.xlu0 %v1905_v17, %s1805_s8  ;;  %v1055_v7 = vsel %vm1045_vm4, %v1038_v32, %v2146_v25 }
  0xe0   : > { %v1072_v0 = vsel %vm1062_vm5, %v1055_v7, %v2164_v35  ;;  %v1607_v7 = vld [vmem:[%s1871_s27 + $0x88] sm:$0x3] }
  0xe1   : > { %v997_v56 = vpop.permute.xlu1 %996  ;;  %v981_v38 = vpop.permute.xlu0 %980  ;;  %v1089_v30 = vsel %vm1079_vm6, %v1072_v0, %v2202_v53  ;;  %v643_v53 = vsel %vm354_vm0, %v2300_v19, %v642_v16  ;;  %v973_v19 = vrot.slane %v2352_v4, 2  ;;  %v870_v0 = vrot.slane %v1607_v7, 1 }
  0xe2   : > { %v1156_v18 = vsel %vm1147_vm10, %v1139_v46, %v997_v56  ;;  %v1148_v26 = vsel %vm1147_vm10, %v1131_v63, %v981_v38  ;;  %v1106_v34 = vsel %vm1096_vm7, %v1089_v30, %v2234_v9  ;;  %v953_v63 = vrot.slane %v2357_v27, 2 }
  0xe3   : > { %578 = vrot.lane.b32.xlu1 %v2284_v24, %s1801_s30  ;;  %1684 = vmatprep.mubr.msk.f32.mxu1 %vm1169_vm11, %v1156_v18  ;;  %v730_v56 = vrot.slane %v1593_v55, 2  ;;  %v975_v30 = vrot.slane %v1617_v49, 2 }
  0xe4   : > { %562 = vrot.lane.b32.xlu0 %v1883_v6, %s1801_s30  ;;  %1672 = vmatprep.mubr.msk.f32.mxu0 %vm1169_vm11, %v1148_v26  ;;  %v1064_v6 = vsel %vm1062_vm5, %v1047_v10, %v2166_v36  ;;  %v1123_v36 = vsel %vm1113_vm8, %v1106_v34, %v2265_v51  ;;  %v954_v27 = vsel %vm443_vm1, %v1898_v14, %v953_v63  ;;  %s235_s30 = scalar_lea.vmem %s2730_s2, %s2756_s16 }
  0xe5   : > { %v2366_v40 = vpop.permute.xlu1 %419  ;;  %v2368_v11 = vpop.permute.xlu0 %403  ;;  %v1081_v33 = vsel %vm1079_vm6, %v1064_v6, %v2204_v54  ;;  %v1140_v54 = vsel %vm1130_vm9, %v1123_v36, %v2330_v13 }
  0xe6   : > { %v1098_v35 = vsel %vm1096_vm7, %v1081_v33, %v2236_v37  ;;  %v1041_v38 = vsel %vm1028_vm3, %v1982_v58, %v2366_v40  ;;  %v1033_v4 = vsel %vm1028_vm3, %v1985_v59, %v2368_v11  ;;  %v731_v58 = vsel %vm443_vm1, %v2384_v60, %v730_v56 }
  0xe7   : > { %672 = vrot.lane.b32.xlu1 %v884_v2, %s1802_s5  ;;  %v1581_v2 = vld [vmem:[%s1871_s27 + $0x70] sm:$0x3]  ;;  %v1115_v41 = vsel %vm1113_vm8, %v1098_v35, %v2267_v52  ;;  %v976_v33 = vrot.slane %v1618_v57, 2  ;;  %v955_v35 = vrot.slane %v1605_v31, 2 }
  0xe8   : > { %656 = vrot.lane.b32.xlu0 %v1905_v17, %s1802_s5  ;;  %v622_v25 = vrot.slane %v1581_v2, 1  ;;  %v1132_v9 = vsel %vm1130_vm9, %v1115_v41, %v2332_v45 }
  0xe9   : > { %v667_v22 = vpop.permute.xlu1 %666  ;;  %v651_v47 = vpop.permute.xlu0 %650 }
  0xea   : > { %v2398_v24 = vsel %vm1079_vm6, %v1074_v29, %v667_v22  ;;  %v2401_v17 = vsel %vm1079_vm6, %v1066_v21, %v651_v47  ;;  %v623_v51 = vsel %vm354_vm0, %v1887_v8, %v622_v25  ;;  %v974_v8 = vsel %vm443_vm1, %v2384_v60, %v973_v19  ;;  %v1606_v60 = vld [vmem:[%s1871_s27 + $0x80] sm:$0xff] }
  0xeb   : > { %918 = vrot.lane.b32.xlu1 %v886_v28, %s1805_s8  ;;  %v887_v28 = vrot.slane %v1617_v49, 1  ;;  %v867_v22 = vrot.slane %v1605_v31, 1  ;;  %v868_v55 = vrot.slane %v1606_v60, 1  ;;  %v956_v36 = vrot.slane %v1606_v60, 2 }
  0xec   : > { %902 = vrot.lane.b32.xlu0 %v866_v48, %s1805_s8 }
  0xed   : > { %v2422_v5 = vpop.permute.xlu1 %752  ;;  %v2424_v12 = vpop.permute.xlu0 %736 }
  0xef   : > { %1004 = vrot.lane.b32.xlu1 %v972_v15, %s1806_s24 }
  0xf0   : > { %988 = vrot.lane.b32.xlu0 %v1914_v20, %s1806_s24 }
  0xf1   : > { %v999_v37 = vpop.permute.xlu1 %998  ;;  %v983_v42 = vpop.permute.xlu0 %982 }
  0xf2   : > { %v1157_v46 = vsel %vm1147_vm10, %v1140_v54, %v999_v37  ;;  %v1149_v52 = vsel %vm1147_vm10, %v1132_v9, %v983_v42  ;;  %v871_v54 = vsel %vm354_vm0, %v868_v55, %v870_v0  ;;  %v977_v9 = vsel %vm443_vm1, %v975_v30, %v976_v33 }
  0xf3   : > { %674 = vrot.lane.b32.xlu1 %v643_v53, %s1802_s5  ;;  %1685 = vmatmul.mubr.msk.f32.vlgmr.msra.gmra.mrb[0].mxu1 %vm1169_vm11, %v1157_v46  ;;  %v957_v46 = vsel %vm443_vm1, %v955_v35, %v956_v36 }
  0xf4   : > { %658 = vrot.lane.b32.xlu0 %v623_v51, %s1802_s5  ;;  %1673 = vmatmul.mubr.msk.f32.vlgmr.msra.gmra.mrb[0].mxu0 %vm1169_vm11, %v1149_v52  ;;  %v958_v52 = vrot.slane %v1607_v7, 2  ;;  %s1564_s5 = sshll.u32 %s2756_s16, 5 }
  0xf5   : > { %v422_v13 = vpop.permute.xlu1 %421  ;;  %v406_v45 = vpop.permute.xlu0 %405 }
  0xf6   : > { %v1042_v29 = vsel %vm1028_vm3, %v1996_v1, %v422_v13  ;;  %v1034_v21 = vsel %vm1028_vm3, %v1999_v3, %v406_v45  ;;  %v869_v3 = vsel %vm354_vm0, %v867_v22, %v868_v55  ;;  %v959_v63 = vsel %vm443_vm1, %v956_v36, %v958_v52 }
  0xf7   : > { %760 = vrot.lane.b32.xlu1 %v972_v15, %s1803_s6 }
  0xf8   : > { %744 = vrot.lane.b32.xlu0 %v1914_v20, %s1803_s6  ;;  %v710_v20 = vrot.slane %v1581_v2, 2  ;;  %v1619_v2 = vld [vmem:[%s1871_s27 + $0xe8] sm:$0x3]  ;;  %s1563_s27 = sshll.u32 %s1781_s15, 4 }
  0xf9   : > { %v509_v18 = vpop.permute.xlu1 %508  ;;  %v493_v26 = vpop.permute.xlu0 %492  ;;  %v890_v1 = vrot.slane %v1619_v2, 1  ;;  %v978_v37 = vrot.slane %v1619_v2, 2  ;;  %p242_p6 = scmp.lt.s32.totalorder %s1563_s27, 31 }
  0xfa   : > { %v1058_v39 = vsel %vm1045_vm4, %v1041_v38, %v509_v18  ;;  %v1050_v23 = vsel %vm1045_vm4, %v1033_v4, %v493_v26  ;;  %v711_v11 = vsel %vm443_vm1, %v1898_v14, %v710_v20  ;;  %v888_v14 = vrot.slane %v1618_v57, 1 }
  0xfb   : > { %1006 = vrot.lane.b32.xlu1 %v974_v8, %s1806_s24  ;;  %v979_v19 = vsel %vm443_vm1, %v976_v33, %v978_v37  ;;  %s2758_s27 = smov (!%p242_p6, %s1563_s27), 31 }
  0xfc   : > { %990 = vrot.lane.b32.xlu0 %v954_v27, %s1806_s24  ;;  %v889_v10 = vsel %vm354_vm0, %v887_v28, %v888_v14  ;;  %v891_v34 = vsel %vm354_vm0, %v888_v14, %v890_v1  ;;  %s245_s9 = sadd.s32 %s1564_s5, %s2758_s27 }
  0xfd   : > { %v2476_v59 = vpop.permute.xlu1 %754  ;;  %v2478_v40 = vpop.permute.xlu0 %738  ;;  %s1565_s10 = sshll.u32 %s245_s9, 3 }
  0xfe   : > { %v1108_v22 = vsel %vm1096_vm7, %v2398_v24, %v2476_v59  ;;  %v2741_v59 = vld [vmem:[#allocation2_spill] sm:$0xff]  ;;  %s2652_s11 = scalar_lea.vmem %s2732_s4, %s1565_s10 }
  0xff   : > { %762 = vrot.lane.b32.xlu1 %v731_v58, %s1803_s6 }
 0x100   : > { %746 = vrot.lane.b32.xlu0 %v711_v11, %s1803_s6 }
 0x101   : > { %v2485_v50 = vpop.permute.xlu1 %816  ;;  %v2487_v43 = vpop.permute.xlu0 %800 }
 0x103   : > { %824 = vrot.lane.b32.xlu1 %v1617_v49, %s1804_s7 }
 0x104   : > { %808 = vrot.lane.b32.xlu0 %v1605_v31, %s1804_s7 }
 0x105   : > { %v511_v47 = vpop.permute.xlu1 %510  ;;  %v495_v48 = vpop.permute.xlu0 %494 }
 0x106   : > { %v1059_v44 = vsel %vm1045_vm4, %v1042_v29, %v511_v47  ;;  %v1051_v32 = vsel %vm1045_vm4, %v1034_v21, %v495_v48  ;;  %v1100_v47 = vsel %vm1096_vm7, %v2401_v17, %v2478_v40 }
 0x107   : > { %826 = vrot.lane.b32.xlu1 %v1618_v57, %s1804_s7 }
 0x108   : > { %810 = vrot.lane.b32.xlu0 %v1606_v60, %s1804_s7 }
 0x109   : > { %v573_v15 = vpop.permute.xlu1 %572  ;;  %v557_v16 = vpop.permute.xlu0 %556 }
 0x10a   : > { %v1075_v6 = vsel %vm1062_vm5, %v1058_v39, %v573_v15  ;;  %v1067_v25 = vsel %vm1062_vm5, %v1050_v23, %v557_v16  ;;  %v1107_v39 = vsel %vm1096_vm7, %v2305_v62, %v2422_v5  ;;  %v1099_v23 = vsel %vm1096_vm7, %v2308_v61, %v2424_v12  ;;  %v2742_v15 = vld [vmem:[#allocation3_spill] sm:$0xff] }
 0x10b   : > { %920 = vrot.lane.b32.xlu1 %v889_v10, %s1805_s8  ;;  %v1124_v58 = vsel %vm1113_vm8, %v1107_v39, %v2485_v50  ;;  %v1116_v11 = vsel %vm1113_vm8, %v1099_v23, %v2487_v43 }
 0x10c   : > { %904 = vrot.lane.b32.xlu0 %v869_v3, %s1805_s8 }
 0x10d   : > { %v819_v41 = vpop.permute.xlu1 %818  ;;  %v803_v53 = vpop.permute.xlu0 %802 }
 0x10e   : > { %v1125_v48 = vsel %vm1113_vm8, %v1108_v22, %v819_v41  ;;  %v1117_v55 = vsel %vm1113_vm8, %v1100_v47, %v803_v53 }
 0x10f   : > { %922 = vrot.lane.b32.xlu1 %v891_v34, %s1805_s8 }
 0x110   : > { %906 = vrot.lane.b32.xlu0 %v871_v54, %s1805_s8  ;;  %s238_s8 = scalar_lea.vmem %s2731_s3, %s2756_s16 }
 0x111   : > { %v913_v42 = vpop.permute.xlu1 %912  ;;  %v897_v51 = vpop.permute.xlu0 %896 }
 0x112   : > { %v1141_v49 = vsel %vm1130_vm9, %v1124_v58, %v913_v42  ;;  %v1133_v31 = vsel %vm1130_vm9, %v1116_v11, %v897_v51 }
 0x113   : > { %1008 = vrot.lane.b32.xlu1 %v977_v9, %s1806_s24 }
 0x114   : > { %992 = vrot.lane.b32.xlu0 %v957_v46, %s1806_s24 }
 0x115   : > { %v575_v13 = vpop.permute.xlu1 %574  ;;  %v559_v45 = vpop.permute.xlu0 %558 }
 0x116   : > { %v1076_v8 = vsel %vm1062_vm5, %v1059_v44, %v575_v13  ;;  %v1068_v56 = vsel %vm1062_vm5, %v1051_v32, %v559_v45 }
 0x117   : > { %1010 = vrot.lane.b32.xlu1 %v979_v19, %s1806_s24 }
 0x118   : > { %994 = vrot.lane.b32.xlu0 %v959_v63, %s1806_s24 }
 0x119   : > { %v669_v38 = vpop.permute.xlu1 %668  ;;  %v653_v4 = vpop.permute.xlu0 %652 }
 0x11a   : > { %v2525_v18 = vsel %vm1079_vm6, %v1075_v6, %v669_v38  ;;  %v2528_v26 = vsel %vm1079_vm6, %v1067_v25, %v653_v4 }
 0x11d   : > { %v915_v27 = vpop.permute.xlu1 %914  ;;  %v899_v20 = vpop.permute.xlu0 %898 }
 0x11e   : > { %v1142_v2 = vsel %vm1130_vm9, %v1125_v48, %v915_v27  ;;  %v1134_v44 = vsel %vm1130_vm9, %v1117_v55, %v899_v20 }
 0x121   : > { %v1001_v57 = vpop.permute.xlu1 %1000  ;;  %v985_v60 = vpop.permute.xlu0 %984 }
 0x122   : > { %v1158_v28 = vsel %vm1147_vm10, %v1141_v49, %v1001_v57  ;;  %v1150_v62 = vsel %vm1147_vm10, %v1133_v31, %v985_v60 }
 0x123   : > { %1675 = vmatprep.mubr.msk.f32.mxu0 %vm1169_vm11, %v1150_v62  ;;  %1687 = vmatprep.mubr.msk.f32.mxu1 %vm1169_vm11, %v1158_v28 }
 0x125   : > { %v424_v61 = vpop.permute.xlu1 %423  ;;  %v408_v5 = vpop.permute.xlu0 %407 }
 0x126   : > { %v1043_v40 = vsel %vm1028_vm3, %v2741_v59, %v424_v61  ;;  %v1035_v16 = vsel %vm1028_vm3, %v2742_v15, %v408_v5 }
 0x129   : > { %v671_v12 = vpop.permute.xlu1 %670  ;;  %v655_v50 = vpop.permute.xlu0 %654 }
 0x12a   : > { %v1093_v43 = vsel %vm1079_vm6, %v1076_v8, %v671_v12  ;;  %v1085_v14 = vsel %vm1079_vm6, %v1068_v56, %v655_v50 }
 0x12d   : > { %v757_v29 = vpop.permute.xlu1 %756  ;;  %v741_v21 = vpop.permute.xlu0 %740 }
 0x12e   : > { %v1109_v8 = vsel %vm1096_vm7, %v2525_v18, %v757_v29  ;;  %v1101_v56 = vsel %vm1096_vm7, %v2528_v26, %v741_v21 }
 0x131   : > { %v1003_v32 = vpop.permute.xlu1 %1002  ;;  %v987_v7 = vpop.permute.xlu0 %986 }
 0x132   : > { %v1159_v10 = vsel %vm1147_vm10, %v1142_v2, %v1003_v32  ;;  %v1151_v1 = vsel %vm1147_vm10, %v1134_v44, %v987_v7 }
 0x133   : > { %1676 = vmatmul.mubr.msk.f32.gmra.mrb[2].mxu0 %vm1169_vm11, %v1151_v1  ;;  %1688 = vmatmul.mubr.msk.f32.gmra.mrb[2].mxu1 %vm1169_vm11, %v1159_v10 }
 0x135   : > { %v2562_v24 = vpop.permute.xlu1 %425  ;;  %v2564_v17 = vpop.permute.xlu0 %409 }
 0x139   : > { %v513_v3 = vpop.permute.xlu1 %512  ;;  %v497_v0 = vpop.permute.xlu0 %496 }
 0x13a   : > { %v1060_v6 = vsel %vm1045_vm4, %v1043_v40, %v513_v3  ;;  %v1052_v25 = vsel %vm1045_vm4, %v1035_v16, %v497_v0  ;;  %v2743_v40 = vld [vmem:[#allocation4_spill] sm:$0xff]  ;;  %v2744_v0 = vld [vmem:[#allocation5_spill] sm:$0xff] }
 0x13b   : > { %v1044_v15 = vsel %vm1028_vm3, %v2743_v40, %v2562_v24 }
 0x13d   : > { %v759_v30 = vpop.permute.xlu1 %758  ;;  %v743_v33 = vpop.permute.xlu0 %742 }
 0x13e   : > { %v1110_v57 = vsel %vm1096_vm7, %v1093_v43, %v759_v30  ;;  %v1102_v60 = vsel %vm1096_vm7, %v1085_v14, %v743_v33  ;;  %v1036_v30 = vsel %vm1028_vm3, %v2744_v0, %v2564_v17 }
 0x141   : > { %v821_v34 = vpop.permute.xlu1 %820  ;;  %v805_v35 = vpop.permute.xlu0 %804 }
 0x142   : > { %v1126_v38 = vsel %vm1113_vm8, %v1109_v8, %v821_v34  ;;  %v1118_v4 = vsel %vm1113_vm8, %v1101_v56, %v805_v35 }
 0x145   : > { %v515_v36 = vpop.permute.xlu1 %514  ;;  %v499_v41 = vpop.permute.xlu0 %498 }
 0x146   : > { %v1053_v34 = vsel %vm1045_vm4, %v1036_v30, %v499_v41 }
 0x149   : > { %v577_v53 = vpop.permute.xlu1 %576  ;;  %v561_v54 = vpop.permute.xlu0 %560 }
 0x14a   : > { %v1077_v32 = vsel %vm1062_vm5, %v1060_v6, %v577_v53  ;;  %v1069_v10 = vsel %vm1062_vm5, %v1052_v25, %v561_v54  ;;  %v1061_v6 = vsel %vm1045_vm4, %v1044_v15, %v515_v36 }
 0x14d   : > { %v823_v9 = vpop.permute.xlu1 %822  ;;  %v807_v37 = vpop.permute.xlu0 %806 }
 0x14e   : > { %v1127_v28 = vsel %vm1113_vm8, %v1110_v57, %v823_v9  ;;  %v1119_v62 = vsel %vm1113_vm8, %v1102_v60, %v807_v37 }
 0x151   : > { %v917_v42 = vpop.permute.xlu1 %916  ;;  %v901_v51 = vpop.permute.xlu0 %900 }
 0x152   : > { %v1143_v27 = vsel %vm1130_vm9, %v1126_v38, %v917_v42  ;;  %v1135_v39 = vsel %vm1130_vm9, %v1118_v4, %v901_v51 }
 0x155   : > { %v579_v46 = vpop.permute.xlu1 %578 }
 0x156   : > { %v563_v52 = vpop.permute.xlu0 %562  ;;  %v1078_v35 = vsel %vm1062_vm5, %v1061_v6, %v579_v46 }
 0x157   : > { %v1070_v9 = vsel %vm1062_vm5, %v1053_v34, %v563_v52 }
 0x159   : > { %v673_v19 = vpop.permute.xlu1 %672 }
 0x15a   : > { %v657_v13 = vpop.permute.xlu0 %656  ;;  %v1094_v1 = vsel %vm1079_vm6, %v1077_v32, %v673_v19 }
 0x15b   : > { %v1086_v16 = vsel %vm1079_vm6, %v1069_v10, %v657_v13 }
 0x15d   : > { %v919_v45 = vpop.permute.xlu1 %918 }
 0x15e   : > { %v903_v63 = vpop.permute.xlu0 %902  ;;  %v1144_v61 = vsel %vm1130_vm9, %v1127_v28, %v919_v45 }
 0x15f   : > { %v1136_v12 = vsel %vm1130_vm9, %v1119_v62, %v903_v63 }
 0x161   : > { %v1005_v20 = vpop.permute.xlu1 %1004 }
 0x162   : > { %v1160_v23 = vsel %vm1147_vm10, %v1143_v27, %v1005_v20  ;;  %v989_v58 = vpop.permute.xlu0 %988  ;;  %v2640_v27 = vld [vmem:[%s235_s30] ss:$0 sm:$0xff] }
 0x163   : > { %v1152_v11 = vsel %vm1147_vm10, %v1135_v39, %v989_v58  ;;  %1690 = vmatprep.mubr.msk.f32.mxu1 %vm1169_vm11, %v1160_v23  ;;  %v2642_v20 = vld [vmem:[%s238_s8] ss:$0 sm:$0xff] }
 0x164   : > { %1678 = vmatprep.mubr.msk.f32.mxu0 %vm1169_vm11, %v1152_v11 }
 0x165   : > { %v675_v18 = vpop.permute.xlu1 %674 }
 0x166   : > { %v659_v26 = vpop.permute.xlu0 %658  ;;  %v1095_v37 = vsel %vm1079_vm6, %v1078_v35, %v675_v18 }
 0x167   : > { %v1087_v51 = vsel %vm1079_vm6, %v1070_v9, %v659_v26 }
 0x169   : > { %v761_v49 = vpop.permute.xlu1 %760 }
 0x16a   : > { %v745_v31 = vpop.permute.xlu0 %744  ;;  %v1111_v3 = vsel %vm1096_vm7, %v1094_v1, %v761_v49 }
 0x16b   : > { %v1103_v33 = vsel %vm1096_vm7, %v1086_v16, %v745_v31 }
 0x16d   : > { %v1007_v5 = vpop.permute.xlu1 %1006 }
 0x16e   : > { %v1161_v50 = vsel %vm1147_vm10, %v1144_v61, %v1007_v5  ;;  %v991_v29 = vpop.permute.xlu0 %990 }
 0x16f   : > { %v1153_v21 = vsel %vm1147_vm10, %v1136_v12, %v991_v29  ;;  %1691 = vmatmul.mubr.msk.f32.gmra.mrb[4].mxu1 %vm1169_vm11, %v1161_v50 }
 0x170   : > { %1679 = vmatmul.mubr.msk.f32.gmra.mrb[4].mxu0 %vm1169_vm11, %v1153_v21 }
 0x171   : > { %v763_v43 = vpop.permute.xlu1 %762 }
 0x172   : > { %v747_v14 = vpop.permute.xlu0 %746  ;;  %v1112_v41 = vsel %vm1096_vm7, %v1095_v37, %v763_v43 }
 0x173   : > { %v1104_v19 = vsel %vm1096_vm7, %v1087_v51, %v747_v14 }
 0x175   : > { %v825_v22 = vpop.permute.xlu1 %824 }
 0x176   : > { %v809_v47 = vpop.permute.xlu0 %808  ;;  %v1128_v25 = vsel %vm1113_vm8, %v1111_v3, %v825_v22 }
 0x177   : > { %v1120_v24 = vsel %vm1113_vm8, %v1103_v33, %v809_v47 }
 0x179   : > { %v827_v48 = vpop.permute.xlu1 %826 }
 0x17a   : > { %v811_v55 = vpop.permute.xlu0 %810  ;;  %v1129_v52 = vsel %vm1113_vm8, %v1112_v41, %v827_v48 }
 0x17b   : > { %v1121_v13 = vsel %vm1113_vm8, %v1104_v19, %v811_v55 }
 0x17d   : > { %v921_v2 = vpop.permute.xlu1 %920 }
 0x17e   : > { %v905_v44 = vpop.permute.xlu0 %904  ;;  %v1145_v53 = vsel %vm1130_vm9, %v1128_v25, %v921_v2 }
 0x17f   : > { %v1137_v17 = vsel %vm1130_vm9, %v1120_v24, %v905_v44 }
 0x181   : > { %v923_v7 = vpop.permute.xlu1 %922 }
 0x182   : > { %v907_v59 = vpop.permute.xlu0 %906  ;;  %v1146_v45 = vsel %vm1130_vm9, %v1129_v52, %v923_v7 }
 0x183   : > { %v1138_v8 = vsel %vm1130_vm9, %v1121_v13, %v907_v59 }
 0x185   : > { %v1009_v54 = vpop.permute.xlu1 %1008 }
 0x186   : > { %v1162_v36 = vsel %vm1147_vm10, %v1145_v53, %v1009_v54  ;;  %v993_v42 = vpop.permute.xlu0 %992 }
 0x187   : > { %v1154_v46 = vsel %vm1147_vm10, %v1137_v17, %v993_v42  ;;  %1693 = vmatprep.mubr.msk.f32.mxu1 %vm1169_vm11, %v1162_v36 }
 0x188   : > { %1681 = vmatprep.mubr.msk.f32.mxu0 %vm1169_vm11, %v1154_v46 }
 0x189   : > { %v1011_v63 = vpop.permute.xlu1 %1010 }
 0x18a   : > { %v1163_v56 = vsel %vm1147_vm10, %v1146_v45, %v1011_v63  ;;  %v995_v38 = vpop.permute.xlu0 %994 }
 0x18b   : > { %v1155_v4 = vsel %vm1147_vm10, %v1138_v8, %v995_v38  ;;  %1694 = vmatmul.mubr.msk.f32.gmra.mrb[6].mxu1 %vm1169_vm11, %v1163_v56 }
 0x18c   : > { %1682 = vmatmul.mubr.msk.f32.gmra.mrb[6].mxu0 %vm1169_vm11, %v1155_v4 }
 0x1c6   : > { %v1686_v39 = vpop.f32.mrb[0].mxu1 }
 0x1c7   : > { %v1674_v23 = vpop.f32.mrb[0].mxu0  ;;  %v1383_v58 = vsub.f32 %v1686_v39, %v2640_v27  ;;  %v1328_v11 = vpop.f32.mrb[1].mxu1 }
 0x1c8   : > { %v1375_v18 = vsub.f32 %v1674_v23, %v2640_v27  ;;  %v1288_v26 = vpop.f32.mrb[1].mxu0  ;;  %v1382_v49 = vsub.f32 %v1328_v11, %v2640_v27 }
 0x1c9   : > { %v1406_v31 = vmul.f32 %v2642_v20, %v1383_v58  ;;  %v1374_v57 = vsub.f32 %v1288_v26, %v2640_v27 }
 0x1ca   : > { %v1398_v60 = vmul.f32 %v2642_v20, %v1375_v18  ;;  %v1405_v28 = vmul.f32 %v2642_v20, %v1382_v49 }
 0x1cb   : > { %v1422_v62 = vmax.f32 %v1406_v31, 0.0  ;;  %v1397_v61 = vmul.f32 %v2642_v20, %v1374_v57 }
 0x1cc   : > { %v1414_v5 = vmax.f32 %v1398_v60, 0.0  ;;  %v1421_v12 = vmax.f32 %v1405_v28, 0.0 }
 0x1cd   : > { %1438 = vst.msk [vmem:[%s2652_s11 + $0x48] sm:$0xff] %vm1147_vm10, %v1422_v62  ;;  %v1413_v50 = vmax.f32 %v1397_v61, 0.0 }
 0x1ce   : > { %1430 = vst.msk [vmem:[%s2652_s11 + $0x8] sm:$0xff] %vm1147_vm10, %v1414_v5  ;;  %1437 = vst.msk [vmem:[%s2652_s11 + $0x40] sm:$0xff] %vm1147_vm10, %v1421_v12 }
 0x1cf   : > { %1429 = vst.msk [vmem:[%s2652_s11] sm:$0xff] %vm1147_vm10, %v1413_v50 }
 0x206   : > { %v1677_v29 = vpop.f32.mrb[2].mxu0  ;;  %v1689_v21 = vpop.f32.mrb[2].mxu1 }
 0x207   : > { %v1377_v43 = vsub.f32 %v1677_v29, %v2640_v27  ;;  %v1385_v14 = vsub.f32 %v1689_v21, %v2640_v27  ;;  %v1298_v22 = vpop.f32.mrb[3].mxu0  ;;  %v1338_v47 = vpop.f32.mrb[3].mxu1 }
 0x208   : > { %v1376_v48 = vsub.f32 %v1298_v22, %v2640_v27  ;;  %v1384_v55 = vsub.f32 %v1338_v47, %v2640_v27 }
 0x209   : > { %v1400_v2 = vmul.f32 %v2642_v20, %v1377_v43  ;;  %v1408_v44 = vmul.f32 %v2642_v20, %v1385_v14 }
 0x20a   : > { %v1399_v32 = vmul.f32 %v2642_v20, %v1376_v48  ;;  %v1407_v7 = vmul.f32 %v2642_v20, %v1384_v55 }
 0x20b   : > { %v1416_v10 = vmax.f32 %v1400_v2, 0.0  ;;  %v1424_v1 = vmax.f32 %v1408_v44, 0.0 }
 0x20c   : > { %v1415_v59 = vmax.f32 %v1399_v32, 0.0  ;;  %v1423_v40 = vmax.f32 %v1407_v7, 0.0 }
 0x20d   : > { %1432 = vst.msk [vmem:[%s2652_s11 + $0x18] sm:$0xff] %vm1147_vm10, %v1416_v10  ;;  %1440 = vst.msk [vmem:[%s2652_s11 + $0x58] sm:$0xff] %vm1147_vm10, %v1424_v1 }
 0x20e   : > { %1431 = vst.msk [vmem:[%s2652_s11 + $0x10] sm:$0xff] %vm1147_vm10, %v1415_v59  ;;  %1439 = vst.msk [vmem:[%s2652_s11 + $0x50] sm:$0xff] %vm1147_vm10, %v1423_v40 }
 0x242   : > { %v1692_v15 = vpop.f32.mrb[4].mxu1 }
 0x243   : > { %v1680_v16 = vpop.f32.mrb[4].mxu0  ;;  %v1387_v3 = vsub.f32 %v1692_v15, %v2640_v27  ;;  %v1348_v0 = vpop.f32.mrb[5].mxu1 }
 0x244   : > { %v1379_v30 = vsub.f32 %v1680_v16, %v2640_v27  ;;  %v1308_v6 = vpop.f32.mrb[5].mxu0  ;;  %v1386_v33 = vsub.f32 %v1348_v0, %v2640_v27 }
 0x245   : > { %v1410_v25 = vmul.f32 %v2642_v20, %v1387_v3  ;;  %v1378_v34 = vsub.f32 %v1308_v6, %v2640_v27 }
 0x246   : > { %v1402_v35 = vmul.f32 %v2642_v20, %v1379_v30  ;;  %v1409_v24 = vmul.f32 %v2642_v20, %v1386_v33 }
 0x247   : > { %v1426_v53 = vmax.f32 %v1410_v25, 0.0  ;;  %v1401_v54 = vmul.f32 %v2642_v20, %v1378_v34 }
 0x248   : > { %v1418_v9 = vmax.f32 %v1402_v35, 0.0  ;;  %v1425_v37 = vmax.f32 %v1409_v24, 0.0 }
 0x249   : > { %1442 = vst.msk [vmem:[%s2652_s11 + $0x68] sm:$0xff] %vm1147_vm10, %v1426_v53  ;;  %v1417_v17 = vmax.f32 %v1401_v54, 0.0 }
 0x24a   : > { %1434 = vst.msk [vmem:[%s2652_s11 + $0x28] sm:$0xff] %vm1147_vm10, %v1418_v9  ;;  %1441 = vst.msk [vmem:[%s2652_s11 + $0x60] sm:$0xff] %vm1147_vm10, %v1425_v37 }
 0x24b   : > { %1433 = vst.msk [vmem:[%s2652_s11 + $0x20] sm:$0xff] %vm1147_vm10, %v1417_v17 }
 0x25e   : > { %v1695_v36 = vpop.f32.mrb[6].mxu1 }
 0x25f   : > { %v1683_v42 = vpop.f32.mrb[6].mxu0  ;;  %v1389_v51 = vsub.f32 %v1695_v36, %v2640_v27  ;;  %v1358_v41 = vpop.f32.mrb[7].mxu1 }
 0x260   : > { %v1381_v46 = vsub.f32 %v1683_v42, %v2640_v27  ;;  %v1318_v19 = vpop.f32.mrb[7].mxu0  ;;  %v1388_v52 = vsub.f32 %v1358_v41, %v2640_v27 }
 0x261   : > { %v1412_v13 = vmul.f32 %v2642_v20, %v1389_v51  ;;  %v1380_v45 = vsub.f32 %v1318_v19, %v2640_v27 }
 0x262   : > { %v1404_v63 = vmul.f32 %v2642_v20, %v1381_v46  ;;  %v1411_v8 = vmul.f32 %v2642_v20, %v1388_v52 }
 0x263   : > { %v1428_v56 = vmax.f32 %v1412_v13, 0.0  ;;  %v1403_v38 = vmul.f32 %v2642_v20, %v1380_v45 }
 0x264   : > { %v1420_v4 = vmax.f32 %v1404_v63, 0.0  ;;  %v1427_v39 = vmax.f32 %v1411_v8, 0.0 }
 0x265   : > { %1444 = vst.msk [vmem:[%s2652_s11 + $0x78] sm:$0xff] %vm1147_vm10, %v1428_v56  ;;  %v1419_v23 = vmax.f32 %v1403_v38, 0.0 }
 0x266   : > { %1436 = vst.msk [vmem:[%s2652_s11 + $0x38] sm:$0xff] %vm1147_vm10, %v1420_v4  ;;  %1443 = vst.msk [vmem:[%s2652_s11 + $0x70] sm:$0xff] %vm1147_vm10, %v1427_v39 }
 0x267   : > { %1435 = vst.msk [vmem:[%s2652_s11 + $0x30] sm:$0xff] %vm1147_vm10, %v1419_v23 }
 0x268 PF: > { %s14_s19 = sadd.s32 1, %s1797_s19   ;;  %s2745_s15 = smov %s1789_s17 }
 0x269   : > { %p11_p7 = scmp.ge.s32.totalorder %s14_s19, 6   ;;  %s2746_s16 = smov %s1793_s18 }
 0x26a   : > { %s2747_s17 = smov %s2750_s20  ;;  %s2748_s18 = smov %s2754_s21 }
 0x26b   :  { %13 = sbr.rel (!%p11_p7) target bundleno = 3 (0x3), region = 75 }

// kernel: up_forward.2
= control target key start
LH: loop header
LB: loop body
LE: loop exit
PB: predicated region body
PF: predicated region fallthrough
CT: control target
= control target key end

     0   :  { %s1728_s9 = smov 0   ;;  %s1730_s10 = smov 0   ;;  %s2423_s0 = inlined_call_operand.vmem [shape: f32[2,18,18,4], index: 0, kind: input, shape index: {}]   ;;  %s2424_s1 = inlined_call_operand.vmem [shape: f32[36,32], index: 1, kind: input, shape index: {}]   ;;  %s2425_s2 = inlined_call_operand.vmem [shape: f32[2,2,2,32], index: 2, kind: output, shape index: {}]  }
   0x1   :  { %s1732_s11 = smov 0   ;;  %s1734_s12 = smov 0  }
   0x2   :  { %s1736_s13 = smov 0  }
   0x3 LB: > { %s21_s14 = sadd.s32 1, %s1695_s11  ;;  %s24_s15 = sadd.s32 1, %s1699_s12  ;;  %s1703_s13 = sphi %s1736_s13, %s12_s13   ;;  %s1699_s12 = sphi %s1734_s12, %s2429_s12   ;;  %s1695_s11 = sphi %s1732_s11, %s2428_s11   ;;  %s1691_s10 = sphi %s1730_s10, %s2427_s10   ;;  %s1687_s9 = sphi %s1728_s9, %s2426_s9  }
   0x4   : > { %p22_p0 = scmp.ge.s32.totalorder %s21_s14, 2  ;;  %p1470_p1 = scmp.ge.s32.totalorder %s1703_s13, 1 }
   0x5   : > { %p126_p2 = scmp.lt.s32.totalorder %s1703_s13, 5 }
   0x6   : > { %s2431_s14 = smov (%p22_p0, %s21_s14), 0  ;;  %s2433_s15 = smov (!%p22_p0, %s24_s15), %s1699_s12 }
   0x7   : > { %p127_p3 = pnand %p1470_p1, %p126_p2  ;;  %p26_p4 = scmp.ge.s32.totalorder %s2433_s15, 2 }
   0x8   : > { %p151_p5 = scmp.lt.s32.totalorder (!%p127_p3), %s1691_s10, 1  ;;  %s1475_s16 = smul.u32 (!%p127_p3), 192, %s1687_s9  ;;  %vm358_vm0 = vcmask (!%p127_p3), 1045504   ;;  %vm269_vm1 = vcmask (!%p127_p3), 1046528   ;;  %v1079_v32 = vld [vmem:[%s2424_s1] sm:$0xff] (!%p127_p3)  ;;  %v1080_v33 = vld [vmem:[%s2424_s1 + $0x8] sm:$0xff] (!%p127_p3) }
   0x9   : > { %s2435_s15 = smov (%p26_p4, %s2433_s15), 0  ;;  %130 = sbr.rel (%p127_p3) target bundleno = 625 (0x271), region = 28 }
   0xa   : > { %s1705_s22 = smov (!%p127_p3), 12   ;;  %s1706_s23 = smov (!%p127_p3), 8   ;;  %v1602_v34 = vpack.c.bf16 (!%p127_p3), %v1080_v33, %v1079_v32  ;;  %v1081_v38 = vld [vmem:[%s2424_s1 + $0x10] sm:$0xff] (!%p127_p3)  ;;  %v1082_v39 = vld [vmem:[%s2424_s1 + $0x18] sm:$0xff] (!%p127_p3)  ;;  %v1083_v43 = vld [vmem:[%s2424_s1 + $0x20] sm:$0xf] (!%p127_p3) }
   0xb   : > { %s1707_s24 = smov (!%p127_p3), 4   ;;  %s1708_s25 = smov (!%p127_p3), 16   ;;  %v1606_v41 = vpack.c.bf16 (!%p127_p3), %v1082_v39, %v1081_v38  ;;  %vm1133_vm2 = vcmask (!%p127_p3), 1043456   ;;  %vm943_vm3 = vcmask (!%p127_p3), 31744   ;;  %vm960_vm4 = vcmask (!%p127_p3), 64512  }
   0xc   : > { %s1709_s26 = smov (!%p127_p3), 20   ;;  %s1710_s3 = smov (!%p127_p3), 24   ;;  %1603 = vmatprep.subr.bf16.mxu0 (!%p127_p3), %v1602_v34  ;;  %1610 = vmatprep.subr.bf16.mxu1 (!%p127_p3), %v1602_v34  ;;  %vm977_vm5 = vcmask (!%p127_p3), 97280   ;;  %vm994_vm6 = vcmask (!%p127_p3), 130048   ;;  %vm1011_vm7 = vcmask (!%p127_p3), 162816   ;;  %vm1028_vm8 = vcmask (!%p127_p3), 195584  }
   0xd   : > { %1605 = vmatpush3.bf16.msra.mxu0 (!%p127_p3), %v1602_v34  ;;  %1613 = vmatpush3.bf16.msra.mxu1 (!%p127_p3), %v1602_v34  ;;  %s1711_s8 = smov (!%p127_p3), 28   ;;  %s1712_s18 = smov (!%p127_p3), 32   ;;  %vm1045_vm9 = vcmask (!%p127_p3), 228352   ;;  %vm1062_vm10 = vcmask (!%p127_p3), 261120   ;;  %vm1084_vm11 = vcmask (!%p127_p3), 293888   ;;  %vm1372_vm12 = vcmask (!%p127_p3), 1040384  }
   0xe   : > { %1607 = vmatprep.subr.bf16.mxu0 (!%p127_p3), %v1606_v41  ;;  %1611 = vmatprep.subr.bf16.mxu1 (!%p127_p3), %v1606_v41  ;;  %p158_p6 = scmp.lt.s32.totalorder (!%p127_p3), %s1687_s9, 1  ;;  %vm1374_vm13 = vcmask (!%p127_p3), 254976  }
  0x10   : > { %s2437_s10 = smov (!%p151_p5, %s1691_s10), 1  ;;  %s2439_s9 = smov (!%p158_p6, %s1687_s9), 1 }
  0x11   : > { %s1616_s17 = smul.u32 432, %s2437_s10  ;;  %1609 = vmatpush3.bf16.msra.mxu0 %v1606_v41  ;;  %1614 = vmatpush3.bf16.msra.mxu1 %v1606_v41  ;;  %s1472_s19 = sshll.u32 %s2437_s10, 1 }
  0x12   : > { %1576 = vmatprep.subr.msk.mxu0 %vm1133_vm2, %v1083_v43  ;;  %1612 = vmatprep.subr.msk.mxu1 %vm1133_vm2, %v1083_v43 }
  0x13   : > { %s155_s20 = scalar_lea.vmem %s2423_s0, %s1616_s17 }
  0x14   : > { %s1767_s21 = scalar_lea.vmem %s155_s20, %s1475_s16  ;;  %s161_s20 = sadd.s32 %s1472_s19, %s2439_s9 }
  0x15   : > { %v1770_v0 = vld [vmem:[%s1767_s21 + $0x20] sm:$0xff]  ;;  %v1773_v1 = vld [vmem:[%s1767_s21 + $0x18] sm:$0xff]  ;;  %v1783_v3 = vld [vmem:[%s1767_s21 + $0x8] sm:$0xff]  ;;  %1577 = vmatpush3.msk.msra.mxu0 %vm1133_vm2, %v1083_v43  ;;  %1615 = vmatpush3.msk.msra.mxu1 %vm1133_vm2, %v1083_v43 }
  0x16   : > { %v1776_v2 = vld [vmem:[%s1767_s21] sm:$0xff]  ;;  %465 = vrot.lane.b32.xlu1 %v1770_v0, %s1705_s22  ;;  %463 = vrot.lane.b32.xlu0 %v1773_v1, %s1705_s22  ;;  %v360_v5 = vrot.slane %v1783_v3, 2  ;;  %v271_v7 = vrot.slane %v1783_v3, 1  ;;  %v169_v8 = vld [vmem:[%s1767_s21 + $0x10] sm:$0x3]  ;;  %v520_v13 = vrot.slane %v1770_v0, 1 }
  0x17   : > { %v359_v4 = vrot.slane %v1776_v2, 2  ;;  %v270_v6 = vrot.slane %v1776_v2, 1  ;;  %v362_v9 = vrot.slane %v169_v8, 2  ;;  %v273_v10 = vrot.slane %v169_v8, 1  ;;  %v1480_v17 = vld [vmem:[%s1767_s21 + $0x28] sm:$0x3] }
  0x18   : > { %v519_v14 = vrot.slane %v1773_v1, 1  ;;  %v608_v18 = vrot.slane %v1770_v0, 2  ;;  %v607_v19 = vrot.slane %v1773_v1, 2  ;;  %v522_v21 = vrot.slane %v1480_v17, 1  ;;  %v172_v22 = vld [vmem:[%s1767_s21 + $0x28] sm:$0x3] }
  0x19   : > { %v361_v11 = vsel %vm358_vm0, %v359_v4, %v360_v5  ;;  %v272_v12 = vsel %vm269_vm1, %v270_v6, %v271_v7  ;;  %v363_v15 = vsel %vm358_vm0, %v360_v5, %v362_v9  ;;  %v274_v16 = vsel %vm269_vm1, %v271_v7, %v273_v10  ;;  %v1815_v28 = vld [vmem:[%s1767_s21 + $0x30] sm:$0xff]  ;;  %v1819_v31 = vld [vmem:[%s1767_s21 + $0x38] sm:$0xff]  ;;  %v1506_v42 = vld [vmem:[%s1767_s21 + $0x40] sm:$0x3] }
  0x1a   : > { %399 = vrot.lane.b32.xlu1 %v361_v11, %s1706_s23  ;;  %310 = vrot.lane.b32.xlu0 %v272_v12, %s1707_s24  ;;  %v277_v20 = vsel %vm269_vm1, %v519_v14, %v520_v13  ;;  %v609_v23 = vsel %vm358_vm0, %v607_v19, %v608_v18  ;;  %v523_v24 = vsel %vm269_vm1, %v520_v13, %v522_v21  ;;  %v278_v25 = vrot.slane %v172_v22, 1  ;;  %v1483_v47 = vld [vmem:[%s1767_s21 + $0x40] sm:$0x3]  ;;  %v1871_v58 = vld [vmem:[%s1767_s21 + $0x48] sm:$0xff] }
  0x1b   : > { %v610_v27 = vrot.slane %v1480_v17, 2  ;;  %v367_v30 = vrot.slane %v172_v22, 2  ;;  %v767_v35 = vrot.slane %v1815_v28, 1  ;;  %v768_v37 = vrot.slane %v1819_v31, 1  ;;  %v175_v53 = vld [vmem:[%s1767_s21 + $0x40] sm:$0x3] }
  0x1c   : > { %v279_v26 = vsel %vm269_vm1, %v520_v13, %v278_v25  ;;  %v855_v44 = vrot.slane %v1815_v28, 2  ;;  %v856_v45 = vrot.slane %v1819_v31, 2  ;;  %v770_v46 = vrot.slane %v1506_v42, 1  ;;  %v1875_v61 = vld [vmem:[%s1767_s21 + $0x50] sm:$0xff]  ;;  %v1509_v6 = vld [vmem:[%s1767_s21 + $0x58] sm:$0x3] }
  0x1d   : > { %v611_v29 = vsel %vm358_vm0, %v608_v18, %v610_v27  ;;  %v368_v36 = vsel %vm358_vm0, %v608_v18, %v367_v30  ;;  %v769_v40 = vsel %vm269_vm1, %v767_v35, %v768_v37  ;;  %v527_v50 = vrot.slane %v1483_v47, 1  ;;  %v1486_v10 = vld [vmem:[%s1767_s21 + $0x58] sm:$0x3]  ;;  %v1912_v21 = vld [vmem:[%s1767_s21 + $0x60] sm:$0xff]  ;;  %v1512_v30 = vld [vmem:[%s1767_s21 + $0x70] sm:$0x3] }
  0x1e   : > { %401 = vrot.lane.b32.xlu1 %v363_v15, %s1706_s23  ;;  %312 = vrot.lane.b32.xlu0 %v274_v16, %s1707_s24  ;;  %v857_v48 = vsel %vm358_vm0, %v855_v44, %v856_v45  ;;  %v771_v49 = vsel %vm269_vm1, %v768_v37, %v770_v46  ;;  %v858_v52 = vrot.slane %v1506_v42, 2  ;;  %v283_v55 = vrot.slane %v175_v53, 1  ;;  %v178_v16 = vld [vmem:[%s1767_s21 + $0x58] sm:$0x3]  ;;  %v1489_v35 = vld [vmem:[%s1767_s21 + $0x70] sm:$0x3] }
  0x1f   : > { %v528_v51 = vsel %vm269_vm1, %v768_v37, %v527_v50  ;;  %v615_v57 = vrot.slane %v1483_v47, 2  ;;  %v372_v60 = vrot.slane %v175_v53, 2  ;;  %v772_v62 = vrot.slane %v1871_v58, 1  ;;  %v181_v41 = vld [vmem:[%s1767_s21 + $0x70] sm:$0x3]  ;;  %v1961_v53 = vld [vmem:[%s1767_s21 + $0x80] sm:$0xff] }
  0x20   : > { %v859_v54 = vsel %vm358_vm0, %v856_v45, %v858_v52  ;;  %v284_v56 = vsel %vm269_vm1, %v768_v37, %v283_v55  ;;  %v773_v4 = vrot.slane %v1875_v61, 1  ;;  %v860_v7 = vrot.slane %v1871_v58, 2 }
  0x21   : > { %v616_v59 = vsel %vm358_vm0, %v856_v45, %v615_v57  ;;  %v373_v63 = vsel %vm358_vm0, %v856_v45, %v372_v60  ;;  %v861_v8 = vrot.slane %v1875_v61, 2  ;;  %v775_v9 = vrot.slane %v1509_v6, 1 }
  0x22   : > { %314 = vrot.lane.b32.xlu1 %v277_v20, %s1707_s24  ;;  %559 = vrot.lane.b32.xlu0 %v277_v20, %s1708_s25  ;;  %v774_v5 = vsel %vm269_vm1, %v772_v62, %v773_v4  ;;  %v532_v13 = vrot.slane %v1486_v10, 1  ;;  %v863_v15 = vrot.slane %v1509_v6, 2  ;;  %v288_v18 = vrot.slane %v178_v16, 1 }
  0x23   : > { %v862_v11 = vsel %vm358_vm0, %v860_v7, %v861_v8  ;;  %v776_v12 = vsel %vm269_vm1, %v773_v4, %v775_v9  ;;  %v620_v20 = vrot.slane %v1486_v10, 2  ;;  %v777_v25 = vrot.slane %v1912_v21, 1  ;;  %v1492_v10 = vld [vmem:[%s1767_s21 + $0x88] sm:$0x3] }
  0x24   : > { %v533_v14 = vsel %vm269_vm1, %v773_v4, %v532_v13  ;;  %v864_v17 = vsel %vm358_vm0, %v861_v8, %v863_v15  ;;  %v289_v19 = vsel %vm269_vm1, %v773_v4, %v288_v18  ;;  %v865_v32 = vrot.slane %v1912_v21, 2  ;;  %v1515_v4 = vld [vmem:[%s1767_s21 + $0x88] sm:$0x3] }
  0x25   : > { %v621_v22 = vsel %vm358_vm0, %v861_v8, %v620_v20  ;;  %v780_v34 = vrot.slane %v1512_v30, 1  ;;  %v537_v38 = vrot.slane %v1489_v35, 1  ;;  %v293_v43 = vrot.slane %v181_v41, 1  ;;  %v184_v20 = vld [vmem:[%s1767_s21 + $0x88] sm:$0x3] }
  0x26   : > { %647 = vrot.lane.b32.xlu1 %v609_v23, %s1709_s26  ;;  %561 = vrot.lane.b32.xlu0 %v523_v24, %s1708_s25  ;;  %v1916_v24 = vld [vmem:[%s1767_s21 + $0x68] sm:$0xff]  ;;  %v625_v45 = vrot.slane %v1489_v35, 2  ;;  %v382_v50 = vrot.slane %v181_v41, 2  ;;  %v871_v6 = vrot.slane %v1961_v53, 2  ;;  %v785_v7 = vrot.slane %v1515_v4, 1 }
  0x27   : > { %v778_v27 = vrot.slane %v1916_v24, 1  ;;  %v866_v33 = vrot.slane %v1916_v24, 2  ;;  %v542_v13 = vrot.slane %v1492_v10, 1 }
  0x29   : > { %v781_v37 = vsel %vm269_vm1, %v778_v27, %v780_v34  ;;  %v538_v39 = vsel %vm269_vm1, %v778_v27, %v537_v38  ;;  %v294_v44 = vsel %vm269_vm1, %v778_v27, %v293_v43  ;;  %v383_v55 = vsel %vm358_vm0, %v866_v33, %v382_v50 }
  0x2a   : > { %403 = vrot.lane.b32.xlu1 %v609_v23, %s1706_s23  ;;  %316 = vrot.lane.b32.xlu0 %v279_v26, %s1707_s24  ;;  %v377_v23 = vrot.slane %v178_v16, 2 }
  0x2c   : > { %v378_v26 = vsel %vm358_vm0, %v861_v8, %v377_v23  ;;  %v298_v23 = vrot.slane %v184_v20, 1 }
  0x2e   : > { %711 = vrot.lane.b32.xlu1 %v1815_v28, %s1710_s3  ;;  %649 = vrot.lane.b32.xlu0 %v611_v29, %s1709_s26  ;;  %v779_v29 = vsel %vm269_vm1, %v777_v25, %v778_v27 }
  0x32   : > { %467 = vrot.lane.b32.xlu1 %v1815_v28, %s1705_s22  ;;  %405 = vrot.lane.b32.xlu0 %v368_v36, %s1706_s23  ;;  %v867_v36 = vsel %vm358_vm0, %v865_v32, %v866_v33 }
  0x36   : > { %807 = vrot.lane.b32.xlu1 %v769_v40, %s1711_s8  ;;  %713 = vrot.lane.b32.xlu0 %v1819_v31, %s1710_s3 }
  0x3a   : > { %563 = vrot.lane.b32.xlu1 %v769_v40, %s1708_s25  ;;  %469 = vrot.lane.b32.xlu0 %v1819_v31, %s1705_s22 }
  0x3e   : > { %895 = vrot.lane.b32.xlu1 %v857_v48, %s1712_s18  ;;  %809 = vrot.lane.b32.xlu0 %v771_v49, %s1711_s8  ;;  %v626_v49 = vsel %vm358_vm0, %v866_v33, %v625_v45 }
  0x42   : > { %565 = vrot.lane.b32.xlu1 %v528_v51, %s1708_s25  ;;  %318 = vrot.lane.b32.xlu0 %v769_v40, %s1707_s24  ;;  %v868_v40 = vrot.slane %v1512_v30, 2  ;;  %v630_v30 = vrot.slane %v1492_v10, 2 }
  0x44   : > { %v869_v42 = vsel %vm358_vm0, %v866_v33, %v868_v40  ;;  %v631_v35 = vsel %vm358_vm0, %v871_v6, %v630_v30  ;;  %v2025_v40 = vld [vmem:[%s1767_s21 + $0x98] sm:$0xff] }
  0x46   : > { %897 = vrot.lane.b32.xlu1 %v859_v54, %s1712_s18  ;;  %651 = vrot.lane.b32.xlu0 %v857_v48, %s1709_s26 }
  0x4a   : > { %407 = vrot.lane.b32.xlu1 %v857_v48, %s1706_s23  ;;  %320 = vrot.lane.b32.xlu0 %v284_v56, %s1707_s24  ;;  %v1957_v48 = vld [vmem:[%s1767_s21 + $0x78] sm:$0xff]  ;;  %v783_v56 = vrot.slane %v1961_v53, 1 }
  0x4b   : > { %v782_v54 = vrot.slane %v1957_v48, 1 }
  0x4c   : > { %v543_v16 = vsel %vm269_vm1, %v783_v56, %v542_v13 }
  0x4d   : > { %v784_v60 = vsel %vm269_vm1, %v782_v54, %v783_v56 }
  0x4e   : > { %715 = vrot.lane.b32.xlu1 %v1871_v58, %s1710_s3  ;;  %653 = vrot.lane.b32.xlu0 %v616_v59, %s1709_s26 }
  0x52   : > { %471 = vrot.lane.b32.xlu1 %v1871_v58, %s1705_s22  ;;  %409 = vrot.lane.b32.xlu0 %v373_v63, %s1706_s23 }
  0x56   : > { %811 = vrot.lane.b32.xlu1 %v774_v5, %s1711_s8  ;;  %717 = vrot.lane.b32.xlu0 %v1875_v61, %s1710_s3 }
  0x5a   : > { %567 = vrot.lane.b32.xlu1 %v774_v5, %s1708_s25  ;;  %473 = vrot.lane.b32.xlu0 %v1875_v61, %s1705_s22 }
  0x5e   : > { %899 = vrot.lane.b32.xlu1 %v862_v11, %s1712_s18  ;;  %813 = vrot.lane.b32.xlu0 %v776_v12, %s1711_s8  ;;  %v786_v12 = vsel %vm269_vm1, %v783_v56, %v785_v7 }
  0x62   : > { %569 = vrot.lane.b32.xlu1 %v533_v14, %s1708_s25  ;;  %322 = vrot.lane.b32.xlu0 %v774_v5, %s1707_s24  ;;  %v870_v5 = vrot.slane %v1957_v48, 2 }
  0x66   : > { %901 = vrot.lane.b32.xlu1 %v864_v17, %s1712_s18  ;;  %655 = vrot.lane.b32.xlu0 %v862_v11, %s1709_s26  ;;  %v873_v17 = vrot.slane %v1515_v4, 2 }
  0x6a   : > { %411 = vrot.lane.b32.xlu1 %v862_v11, %s1706_s23  ;;  %324 = vrot.lane.b32.xlu0 %v289_v19, %s1707_s24  ;;  %v872_v11 = vsel %vm358_vm0, %v870_v5, %v871_v6 }
  0x6e   : > { %719 = vrot.lane.b32.xlu1 %v1912_v21, %s1710_s3  ;;  %657 = vrot.lane.b32.xlu0 %v621_v22, %s1709_s26  ;;  %v874_v22 = vsel %vm358_vm0, %v871_v6, %v873_v17 }
  0x72   : > { %475 = vrot.lane.b32.xlu1 %v1912_v21, %s1705_s22  ;;  %413 = vrot.lane.b32.xlu0 %v378_v26, %s1706_s23 }
  0x76   : > { %815 = vrot.lane.b32.xlu1 %v779_v29, %s1711_s8  ;;  %721 = vrot.lane.b32.xlu0 %v1916_v24, %s1710_s3 }
  0x7a   : > { %571 = vrot.lane.b32.xlu1 %v779_v29, %s1708_s25  ;;  %477 = vrot.lane.b32.xlu0 %v1916_v24, %s1705_s22 }
  0x7e   : > { %903 = vrot.lane.b32.xlu1 %v867_v36, %s1712_s18  ;;  %817 = vrot.lane.b32.xlu0 %v781_v37, %s1711_s8 }
  0x82   : > { %573 = vrot.lane.b32.xlu1 %v538_v39, %s1708_s25  ;;  %326 = vrot.lane.b32.xlu0 %v779_v29, %s1707_s24  ;;  %v299_v29 = vsel %vm269_vm1, %v783_v56, %v298_v23 }
  0x86   : > { %905 = vrot.lane.b32.xlu1 %v869_v42, %s1712_s18  ;;  %659 = vrot.lane.b32.xlu0 %v867_v36, %s1709_s26 }
  0x88   : > { %v1950_v46 = vpop.permute.xlu1 %465  ;;  %v1952_v47 = vpop.permute.xlu0 %463 }
  0x8a   : > { %415 = vrot.lane.b32.xlu1 %v867_v36, %s1706_s23  ;;  %328 = vrot.lane.b32.xlu0 %v294_v44, %s1707_s24  ;;  %v387_v36 = vrot.slane %v184_v20, 2 }
  0x8c   : > { %v400_v51 = vpop.permute.xlu1 %399  ;;  %v311_v52 = vpop.permute.xlu0 %310 }
  0x8d   : > { %v944_v27 = vsel %vm943_vm3, %v1776_v2, %v311_v52  ;;  %v2015_v2 = vld [vmem:[%s1767_s21 + $0x90] sm:$0xff] }
  0x8e   : > { %723 = vrot.lane.b32.xlu1 %v1957_v48, %s1710_s3  ;;  %661 = vrot.lane.b32.xlu0 %v626_v49, %s1709_s26  ;;  %v961_v34 = vsel %vm960_vm4, %v944_v27, %v400_v51  ;;  %v787_v45 = vrot.slane %v2015_v2, 1  ;;  %v788_v49 = vrot.slane %v2025_v40, 1 }
  0x8f   : > { %v978_v37 = vsel %vm977_vm5, %v961_v34, %v1952_v47  ;;  %v388_v47 = vsel %vm358_vm0, %v871_v6, %v387_v36  ;;  %v875_v6 = vrot.slane %v2015_v2, 2 }
  0x90   : > { %v1969_v57 = vpop.permute.xlu1 %401  ;;  %v313_v59 = vpop.permute.xlu0 %312 }
  0x91   : > { %v945_v42 = vsel %vm943_vm3, %v1783_v3, %v313_v59 }
  0x92   : > { %479 = vrot.lane.b32.xlu1 %v1957_v48, %s1705_s22  ;;  %417 = vrot.lane.b32.xlu0 %v383_v55, %s1706_s23  ;;  %v962_v52 = vsel %vm960_vm4, %v945_v42, %v1969_v57  ;;  %v789_v55 = vsel %vm269_vm1, %v787_v45, %v788_v49  ;;  %v1518_v57 = vld [vmem:[%s1767_s21 + $0xa0] sm:$0x3] }
  0x93   : > { %v979_v56 = vsel %vm977_vm5, %v962_v52, %v1950_v46  ;;  %v876_v46 = vrot.slane %v2025_v40, 2  ;;  %v790_v7 = vrot.slane %v1518_v57, 1 }
  0x94   : > { %v1975_v62 = vpop.permute.xlu1 %314  ;;  %v560_v63 = vpop.permute.xlu0 %559 }
  0x95   : > { %v995_v41 = vsel %vm994_vm6, %v978_v37, %v560_v63  ;;  %v877_v13 = vsel %vm358_vm0, %v875_v6, %v876_v46  ;;  %v946_v42 = vsel %vm943_vm3, %v1773_v1, %v1975_v62  ;;  %v2108_v1 = vld [vmem:[%s1767_s21 + $0xb0] sm:$0xff] }
  0x96   : > { %819 = vrot.lane.b32.xlu1 %v784_v60, %s1711_s8  ;;  %725 = vrot.lane.b32.xlu0 %v1961_v53, %s1710_s3 }
  0x98   : > { %v648_v8 = vpop.permute.xlu1 %647  ;;  %v1983_v9 = vpop.permute.xlu0 %561 }
  0x99   : > { %v1012_v43 = vsel %vm1011_vm7, %v995_v41, %v648_v8  ;;  %v996_v63 = vsel %vm994_vm6, %v979_v56, %v1983_v9 }
  0x9a   : > { %575 = vrot.lane.b32.xlu1 %v784_v60, %s1708_s25  ;;  %481 = vrot.lane.b32.xlu0 %v1961_v53, %s1705_s22 }
  0x9c   : > { %v1991_v14 = vpop.permute.xlu1 %403  ;;  %v1993_v15 = vpop.permute.xlu0 %316 }
  0x9e   : > { %907 = vrot.lane.b32.xlu1 %v872_v11, %s1712_s18  ;;  %821 = vrot.lane.b32.xlu0 %v786_v12, %s1711_s8  ;;  %v1495_v12 = vld [vmem:[%s1767_s21 + $0xa0] sm:$0x3] }
  0x9f   : > { %v547_v17 = vrot.slane %v1495_v12, 1  ;;  %v635_v36 = vrot.slane %v1495_v12, 2 }
  0xa0   : > { %v712_v18 = vpop.permute.xlu1 %711  ;;  %v650_v19 = vpop.permute.xlu0 %649 }
  0xa1   : > { %v1029_v44 = vsel %vm1028_vm8, %v1012_v43, %v712_v18  ;;  %v1013_v4 = vsel %vm1011_vm7, %v996_v63, %v650_v19  ;;  %v548_v20 = vsel %vm269_vm1, %v788_v49, %v547_v17  ;;  %v963_v43 = vsel %vm960_vm4, %v946_v42, %v1991_v14 }
  0xa2   : > { %577 = vrot.lane.b32.xlu1 %v543_v16, %s1708_s25  ;;  %330 = vrot.lane.b32.xlu0 %v784_v60, %s1707_s24  ;;  %v791_v16 = vsel %vm269_vm1, %v788_v49, %v790_v7  ;;  %v636_v45 = vsel %vm358_vm0, %v876_v46, %v635_v36  ;;  %v947_v63 = vsel %vm943_vm3, %v1770_v0, %v1993_v15  ;;  %v1521_v0 = vld [vmem:[%s1767_s21 + $0xb8] sm:$0x3] }
  0xa3   : > { %v190_v36 = vld [vmem:[%s1767_s21 + $0xb8] sm:$0x3] }
  0xa4   : > { %v2002_v25 = vpop.permute.xlu1 %467  ;;  %v2004_v26 = vpop.permute.xlu0 %405 }
  0xa6   : > { %909 = vrot.lane.b32.xlu1 %v874_v22, %s1712_s18  ;;  %663 = vrot.lane.b32.xlu0 %v872_v11, %s1709_s26  ;;  %v878_v22 = vrot.slane %v1518_v57, 2 }
  0xa8   : > { %v808_v32 = vpop.permute.xlu1 %807  ;;  %v714_v33 = vpop.permute.xlu0 %713  ;;  %v879_v30 = vsel %vm358_vm0, %v876_v46, %v878_v22 }
  0xa9   : > { %v1046_v50 = vsel %vm1045_vm9, %v1029_v44, %v808_v32  ;;  %v1030_v5 = vsel %vm1028_vm8, %v1013_v4, %v714_v33  ;;  %v2098_v44 = vld [vmem:[%s1767_s21 + $0xa8] sm:$0xff]  ;;  %v964_v4 = vsel %vm960_vm4, %v947_v63, %v2004_v26 }
  0xaa   : > { %419 = vrot.lane.b32.xlu1 %v872_v11, %s1706_s23  ;;  %332 = vrot.lane.b32.xlu0 %v299_v29, %s1707_s24  ;;  %v187_v29 = vld [vmem:[%s1767_s21 + $0xa0] sm:$0x3] }
  0xab   : > { %v303_v32 = vrot.slane %v187_v29, 1 }
  0xac   : > { %v2020_v38 = vpop.permute.xlu1 %563  ;;  %v2022_v39 = vpop.permute.xlu0 %469 }
  0xad   : > { %v981_v6 = vsel %vm977_vm5, %v964_v4, %v2022_v39  ;;  %v881_v39 = vrot.slane %v2108_v1, 2 }
  0xae   : > { %727 = vrot.lane.b32.xlu1 %v2015_v2, %s1710_s3  ;;  %665 = vrot.lane.b32.xlu0 %v631_v35, %s1709_s26  ;;  %v304_v35 = vsel %vm269_vm1, %v788_v49, %v303_v32  ;;  %v980_v49 = vsel %vm977_vm5, %v963_v43, %v2002_v25  ;;  %v792_v25 = vrot.slane %v2098_v44, 1 }
  0xaf   : > { %v997_v62 = vsel %vm994_vm6, %v980_v49, %v2020_v38 }
  0xb0   : > { %v896_v3 = vpop.permute.xlu1 %895  ;;  %v810_v51 = vpop.permute.xlu0 %809 }
  0xb1   : > { %v1063_v54 = vsel %vm1062_vm10, %v1046_v50, %v896_v3  ;;  %v1047_v8 = vsel %vm1045_vm9, %v1030_v5, %v810_v51 }
  0xb2   : > { %483 = vrot.lane.b32.xlu1 %v2015_v2, %s1705_s22  ;;  %421 = vrot.lane.b32.xlu0 %v388_v47, %s1706_s23  ;;  %v392_v47 = vrot.slane %v187_v29, 2 }
  0xb3   : > { %1578 = vmatprep.mubr.msk.f32.mxu0 %vm1084_vm11, %v1063_v54  ;;  %v793_v54 = vrot.slane %v2108_v1, 1 }
  0xb4   : > { %v2049_v59 = vpop.permute.xlu1 %565  ;;  %v2051_v60 = vpop.permute.xlu0 %318  ;;  %v393_v52 = vsel %vm358_vm0, %v876_v46, %v392_v47 }
  0xb5   : > { %v794_v5 = vsel %vm269_vm1, %v792_v25, %v793_v54  ;;  %v998_v15 = vsel %vm994_vm6, %v981_v6, %v2049_v59  ;;  %v1522_v25 = vld [vmem:[%s1767_s21 + $0xc0] sm:$0xff] }
  0xb6   : > { %823 = vrot.lane.b32.xlu1 %v789_v55, %s1711_s8  ;;  %729 = vrot.lane.b32.xlu0 %v2025_v40, %s1710_s3  ;;  %v797_v63 = vrot.slane %v1522_v25, 1 }
  0xb8   : > { %v898_v10 = vpop.permute.xlu1 %897  ;;  %v652_v11 = vpop.permute.xlu0 %651 }
  0xb9   : > { %v1064_v9 = vsel %vm1062_vm10, %v1047_v8, %v898_v10  ;;  %v1014_v51 = vsel %vm1011_vm7, %v997_v62, %v652_v11  ;;  %v880_v10 = vrot.slane %v2098_v44, 2  ;;  %v795_v11 = vrot.slane %v1521_v0, 1 }
  0xba   : > { %579 = vrot.lane.b32.xlu1 %v789_v55, %s1708_s25  ;;  %485 = vrot.lane.b32.xlu0 %v2025_v40, %s1705_s22 }
  0xbb   : > { %1579 = vmatmul.mubr.msk.f32.vlgmr.msra.gmra.mrb[0].mxu0 %vm1084_vm11, %v1064_v9  ;;  %v882_v17 = vsel %vm358_vm0, %v880_v10, %v881_v39 }
  0xbc   : > { %v2072_v18 = vpop.permute.xlu1 %407  ;;  %v2074_v19 = vpop.permute.xlu0 %320 }
  0xbe   : > { %911 = vrot.lane.b32.xlu1 %v877_v13, %s1712_s18  ;;  %825 = vrot.lane.b32.xlu0 %v791_v16, %s1711_s8  ;;  %v1498_v16 = vld [vmem:[%s1767_s21 + $0xb8] sm:$0x3] }
  0xbf   : > { %v552_v22 = vrot.slane %v1498_v16, 1  ;;  %v640_v47 = vrot.slane %v1498_v16, 2 }
  0xc0   : > { %v716_v23 = vpop.permute.xlu1 %715  ;;  %v654_v27 = vpop.permute.xlu0 %653 }
  0xc1   : > { %v1031_v14 = vsel %vm1028_vm8, %v1014_v51, %v716_v23  ;;  %v1015_v8 = vsel %vm1011_vm7, %v998_v15, %v654_v27  ;;  %v553_v29 = vsel %vm269_vm1, %v793_v54, %v552_v22  ;;  %v948_v51 = vsel %vm943_vm3, %v1815_v28, %v2051_v60 }
  0xc2   : > { %581 = vrot.lane.b32.xlu1 %v548_v20, %s1708_s25  ;;  %334 = vrot.lane.b32.xlu0 %v789_v55, %s1707_s24  ;;  %v796_v20 = vsel %vm269_vm1, %v793_v54, %v795_v11 }
  0xc4   : > { %v2083_v33 = vpop.permute.xlu1 %471  ;;  %v2085_v34 = vpop.permute.xlu0 %409 }
  0xc6   : > { %913 = vrot.lane.b32.xlu1 %v879_v30, %s1712_s18  ;;  %667 = vrot.lane.b32.xlu0 %v877_v13, %s1709_s26  ;;  %v883_v30 = vrot.slane %v1521_v0, 2 }
  0xc8   : > { %v812_v37 = vpop.permute.xlu1 %811  ;;  %v718_v41 = vpop.permute.xlu0 %717 }
  0xc9   : > { %v1048_v55 = vsel %vm1045_vm9, %v1031_v14, %v812_v37  ;;  %v1032_v26 = vsel %vm1028_vm8, %v1015_v8, %v718_v41  ;;  %v884_v37 = vsel %vm358_vm0, %v881_v39, %v883_v30  ;;  %v308_v41 = vrot.slane %v190_v36, 1 }
  0xca   : > { %423 = vrot.lane.b32.xlu1 %v877_v13, %s1706_s23  ;;  %336 = vrot.lane.b32.xlu0 %v304_v35, %s1707_s24  ;;  %v965_v14 = vsel %vm960_vm4, %v948_v51, %v2072_v18 }
  0xcc   : > { %v2103_v50 = vpop.permute.xlu1 %567  ;;  %v2105_v3 = vpop.permute.xlu0 %473 }
  0xce   : > { %731 = vrot.lane.b32.xlu1 %v2098_v44, %s1710_s3  ;;  %669 = vrot.lane.b32.xlu0 %v636_v45, %s1709_s26  ;;  %v309_v45 = vsel %vm269_vm1, %v793_v54, %v308_v41  ;;  %v982_v54 = vsel %vm977_vm5, %v965_v14, %v2083_v33 }
  0xcf   : > { %v999_v28 = vsel %vm994_vm6, %v982_v54, %v2103_v50  ;;  %v949_v50 = vsel %vm943_vm3, %v1819_v31, %v2074_v19  ;;  %v1524_v31 = vld [vmem:[%s1767_s21 + $0xd0] sm:$0x3] }
  0xd0   : > { %v900_v56 = vpop.permute.xlu1 %899  ;;  %v814_v38 = vpop.permute.xlu0 %813  ;;  %v966_v8 = vsel %vm960_vm4, %v949_v50, %v2085_v34  ;;  %v800_v16 = vrot.slane %v1524_v31, 1  ;;  %v888_v41 = vrot.slane %v1524_v31, 2 }
  0xd1   : > { %v1065_v57 = vsel %vm1062_vm10, %v1048_v55, %v900_v56  ;;  %v1049_v12 = vsel %vm1045_vm9, %v1032_v26, %v814_v38  ;;  %v397_v55 = vrot.slane %v190_v36, 2  ;;  %v983_v10 = vsel %vm977_vm5, %v966_v8, %v2105_v3 }
  0xd2   : > { %487 = vrot.lane.b32.xlu1 %v2098_v44, %s1705_s22  ;;  %425 = vrot.lane.b32.xlu0 %v393_v52, %s1706_s23  ;;  %v641_v52 = vsel %vm358_vm0, %v881_v39, %v640_v47 }
  0xd3   : > { %1581 = vmatprep.mubr.msk.f32.mxu0 %vm1084_vm11, %v1065_v57  ;;  %v1523_v57 = vld [vmem:[%s1767_s21 + $0xc8] sm:$0xff]  ;;  %v398_v33 = vsel %vm358_vm0, %v881_v39, %v397_v55 }
  0xd4   : > { %v2134_v46 = vpop.permute.xlu1 %569  ;;  %v2136_v7 = vpop.permute.xlu0 %322  ;;  %v798_v4 = vrot.slane %v1523_v57, 1  ;;  %v1527_v55 = vld [vmem:[%s1767_s21 + $0xe8] sm:$0x3] }
  0xd5   : > { %v1000_v19 = vsel %vm994_vm6, %v983_v10, %v2134_v46 }
  0xd6   : > { %827 = vrot.lane.b32.xlu1 %v794_v5, %s1711_s8  ;;  %733 = vrot.lane.b32.xlu0 %v2108_v1, %s1710_s3  ;;  %v799_v26 = vsel %vm269_vm1, %v797_v63, %v798_v4  ;;  %v950_v63 = vsel %vm943_vm3, %v1871_v58, %v2136_v7 }
  0xd8   : > { %v902_v9 = vpop.permute.xlu1 %901  ;;  %v656_v13 = vpop.permute.xlu0 %655 }
  0xd9   : > { %v1066_v59 = vsel %vm1062_vm10, %v1049_v12, %v902_v9  ;;  %v1016_v60 = vsel %vm1011_vm7, %v999_v28, %v656_v13  ;;  %v885_v9 = vrot.slane %v1522_v25, 2  ;;  %v886_v13 = vrot.slane %v1523_v57, 2 }
  0xda   : > { %583 = vrot.lane.b32.xlu1 %v794_v5, %s1708_s25  ;;  %489 = vrot.lane.b32.xlu0 %v2108_v1, %s1705_s22  ;;  %v805_v28 = vrot.slane %v1527_v55, 1 }
  0xdb   : > { %1582 = vmatmul.mubr.msk.f32.gmra.mrb[2].mxu0 %vm1084_vm11, %v1066_v59  ;;  %v887_v46 = vsel %vm358_vm0, %v885_v9, %v886_v13 }
  0xdc   : > { %v2157_v23 = vpop.permute.xlu1 %411  ;;  %v2159_v27 = vpop.permute.xlu0 %324 }
  0xde   : > { %915 = vrot.lane.b32.xlu1 %v882_v17, %s1712_s18  ;;  %829 = vrot.lane.b32.xlu0 %v796_v20, %s1711_s8  ;;  %v1501_v20 = vld [vmem:[%s1767_s21 + $0xd0] sm:$0x3] }
  0xdf   : > { %v557_v30 = vrot.slane %v1501_v20, 1 }
  0xe0   : > { %v720_v32 = vpop.permute.xlu1 %719  ;;  %v658_v35 = vpop.permute.xlu0 %657 }
  0xe1   : > { %v1033_v18 = vsel %vm1028_vm8, %v1016_v60, %v720_v32  ;;  %v1017_v12 = vsel %vm1011_vm7, %v1000_v19, %v658_v35  ;;  %v558_v36 = vsel %vm269_vm1, %v798_v4, %v557_v30 }
  0xe2   : > { %585 = vrot.lane.b32.xlu1 %v553_v29, %s1708_s25  ;;  %338 = vrot.lane.b32.xlu0 %v794_v5, %s1707_s24  ;;  %v801_v29 = vsel %vm269_vm1, %v798_v4, %v800_v16 }
  0xe4   : > { %v2168_v42 = vpop.permute.xlu1 %475  ;;  %v2170_v43 = vpop.permute.xlu0 %413 }
  0xe6   : > { %917 = vrot.lane.b32.xlu1 %v884_v37, %s1712_s18  ;;  %671 = vrot.lane.b32.xlu0 %v882_v17, %s1709_s26  ;;  %v645_v37 = vrot.slane %v1501_v20, 2 }
  0xe8   : > { %v816_v49 = vpop.permute.xlu1 %815  ;;  %v722_v62 = vpop.permute.xlu0 %721 }
  0xe9   : > { %v1050_v5 = vsel %vm1045_vm9, %v1033_v18, %v816_v49  ;;  %v1034_v34 = vsel %vm1028_vm8, %v1017_v12, %v722_v62  ;;  %v646_v49 = vsel %vm358_vm0, %v886_v13, %v645_v37  ;;  %v889_v62 = vsel %vm358_vm0, %v886_v13, %v888_v41 }
  0xea   : > { %427 = vrot.lane.b32.xlu1 %v882_v17, %s1706_s23  ;;  %340 = vrot.lane.b32.xlu0 %v309_v45, %s1707_s24 }
  0xec   : > { %v2186_v56 = vpop.permute.xlu1 %571  ;;  %v2188_v38 = vpop.permute.xlu0 %477 }
  0xee   : > { %735 = vrot.lane.b32.xlu1 %v1522_v25, %s1710_s3  ;;  %673 = vrot.lane.b32.xlu0 %v641_v52, %s1709_s26  ;;  %v1525_v52 = vld [vmem:[%s1767_s21 + $0xd8] sm:$0xff] }
  0xef   : > { %v890_v4 = vrot.slane %v1525_v52, 2 }
  0xf0   : > { %v904_v6 = vpop.permute.xlu1 %903  ;;  %v818_v0 = vpop.permute.xlu0 %817 }
  0xf1   : > { %v1067_v15 = vsel %vm1062_vm10, %v1050_v5, %v904_v6  ;;  %v1051_v3 = vsel %vm1045_vm9, %v1034_v34, %v818_v0  ;;  %v967_v5 = vsel %vm960_vm4, %v950_v63, %v2157_v23 }
  0xf2   : > { %491 = vrot.lane.b32.xlu1 %v1522_v25, %s1705_s22  ;;  %429 = vrot.lane.b32.xlu0 %v398_v33, %s1706_s23  ;;  %v1526_v25 = vld [vmem:[%s1767_s21 + $0xe0] sm:$0xff]  ;;  %v984_v50 = vsel %vm977_vm5, %v967_v5, %v2168_v42  ;;  %s1473_s21 = sshll.u32 %s161_s20, 1 }
  0xf3   : > { %1584 = vmatprep.mubr.msk.f32.mxu0 %vm1084_vm11, %v1067_v15  ;;  %v803_v54 = vrot.slane %v1526_v25, 1  ;;  %v891_v33 = vrot.slane %v1526_v25, 2  ;;  %v893_v15 = vrot.slane %v1527_v55, 2  ;;  %v1001_v58 = vsel %vm994_vm6, %v984_v50, %v2186_v56  ;;  %s163_s24 = scalar_lea.vmem %s2425_s2, %s1473_s21 }
  0xf4   : > { %v2211_v39 = vpop.permute.xlu1 %573  ;;  %v2213_v11 = vpop.permute.xlu0 %326  ;;  %v951_v56 = vsel %vm943_vm3, %v1875_v61, %v2159_v27 }
  0xf5   : > { %v806_v6 = vsel %vm269_vm1, %v803_v54, %v805_v28  ;;  %v894_v10 = vsel %vm358_vm0, %v891_v33, %v893_v15  ;;  %v892_v31 = vsel %vm358_vm0, %v890_v4, %v891_v33  ;;  %v968_v9 = vsel %vm960_vm4, %v951_v56, %v2170_v43 }
  0xf6   : > { %831 = vrot.lane.b32.xlu1 %v799_v26, %s1711_s8  ;;  %737 = vrot.lane.b32.xlu0 %v1523_v57, %s1710_s3  ;;  %v985_v13 = vsel %vm977_vm5, %v968_v9, %v2188_v38 }
  0xf8   : > { %v906_v59 = vpop.permute.xlu1 %905  ;;  %v660_v17 = vpop.permute.xlu0 %659 }
  0xf9   : > { %v1068_v22 = vsel %vm1062_vm10, %v1051_v3, %v906_v59  ;;  %v1018_v7 = vsel %vm1011_vm7, %v1001_v58, %v660_v17  ;;  %v1002_v59 = vsel %vm994_vm6, %v985_v13, %v2211_v39 }
  0xfa   : > { %587 = vrot.lane.b32.xlu1 %v799_v26, %s1708_s25  ;;  %493 = vrot.lane.b32.xlu0 %v1523_v57, %s1705_s22  ;;  %v802_v57 = vrot.slane %v1525_v52, 1 }
  0xfb   : > { %1585 = vmatmul.mubr.msk.f32.gmra.mrb[4].mxu0 %vm1084_vm11, %v1068_v22 }
  0xfc   : > { %v2230_v32 = vpop.permute.xlu1 %415  ;;  %v2232_v35 = vpop.permute.xlu0 %328  ;;  %v804_v0 = vsel %vm269_vm1, %v802_v57, %v803_v54 }
  0xfe   : > { %919 = vrot.lane.b32.xlu1 %v887_v46, %s1712_s18  ;;  %833 = vrot.lane.b32.xlu0 %v801_v29, %s1711_s8 }
 0x100   : > { %v724_v45 = vpop.permute.xlu1 %723  ;;  %v662_v47 = vpop.permute.xlu0 %661 }
 0x101   : > { %v1035_v23 = vsel %vm1028_vm8, %v1018_v7, %v724_v45  ;;  %v1019_v17 = vsel %vm1011_vm7, %v1002_v59, %v662_v47  ;;  %v952_v45 = vsel %vm943_vm3, %v1912_v21, %v2213_v11  ;;  %v953_v21 = vsel %vm943_vm3, %v1916_v24, %v2232_v35 }
 0x102   : > { %675 = vrot.lane.b32.xlu1 %v887_v46, %s1709_s26  ;;  %589 = vrot.lane.b32.xlu0 %v558_v36, %s1708_s25  ;;  %v969_v47 = vsel %vm960_vm4, %v952_v45, %v2230_v32 }
 0x104   : > { %v480_v51 = vpop.permute.xlu1 %479  ;;  %v2241_v14 = vpop.permute.xlu0 %417 }
 0x105   : > { %v970_v11 = vsel %vm960_vm4, %v953_v21, %v2241_v14 }
 0x106   : > { %677 = vrot.lane.b32.xlu1 %v646_v49, %s1709_s26  ;;  %921 = vrot.lane.b32.xlu0 %v889_v62, %s1712_s18  ;;  %v986_v49 = vsel %vm977_vm5, %v969_v47, %v480_v51 }
 0x108   : > { %v820_v60 = vpop.permute.xlu1 %819  ;;  %v726_v18 = vpop.permute.xlu0 %725 }
 0x109   : > { %v1052_v19 = vsel %vm1045_vm9, %v1035_v23, %v820_v60  ;;  %v1036_v61 = vsel %vm1028_vm8, %v1019_v17, %v726_v18 }
 0x10a   : > { %741 = vrot.lane.b32.xlu1 %v1526_v25, %s1710_s3  ;;  %739 = vrot.lane.b32.xlu0 %v1525_v52, %s1710_s3 }
 0x10c   : > { %v576_v8 = vpop.permute.xlu1 %575  ;;  %v482_v26 = vpop.permute.xlu0 %481 }
 0x10d   : > { %v1003_v52 = vsel %vm994_vm6, %v986_v49, %v576_v8  ;;  %v987_v32 = vsel %vm977_vm5, %v970_v11, %v482_v26 }
 0x10e   : > { %837 = vrot.lane.b32.xlu1 %v806_v6, %s1711_s8  ;;  %835 = vrot.lane.b32.xlu0 %v804_v0, %s1711_s8 }
 0x110   : > { %v908_v42 = vpop.permute.xlu1 %907  ;;  %v822_v12 = vpop.permute.xlu0 %821 }
 0x111   : > { %v1069_v34 = vsel %vm1062_vm10, %v1052_v19, %v908_v42  ;;  %v1053_v27 = vsel %vm1045_vm9, %v1036_v61, %v822_v12 }
 0x112   : > { %925 = vrot.lane.b32.xlu1 %v894_v10, %s1712_s18  ;;  %923 = vrot.lane.b32.xlu0 %v892_v31, %s1712_s18 }
 0x113   : > { %1587 = vmatprep.mubr.msk.f32.mxu0 %vm1084_vm11, %v1069_v34 }
 0x114   : > { %v578_v16 = vpop.permute.xlu1 %577  ;;  %v331_v3 = vpop.permute.xlu0 %330 }
 0x115   : > { %v1004_v33 = vsel %vm994_vm6, %v987_v32, %v578_v16  ;;  %v954_v10 = vsel %vm943_vm3, %v1957_v48, %v331_v3 }
 0x118   : > { %v910_v20 = vpop.permute.xlu1 %909  ;;  %v664_v22 = vpop.permute.xlu0 %663 }
 0x119   : > { %v1070_v43 = vsel %vm1062_vm10, %v1053_v27, %v910_v20  ;;  %v1020_v55 = vsel %vm1011_vm7, %v1003_v52, %v664_v22 }
 0x11a   : > { %1588 = vmatmul.mubr.msk.f32.gmra.mrb[6].mxu0 %vm1084_vm11, %v1070_v43 }
 0x11c   : > { %v420_v46 = vpop.permute.xlu1 %419  ;;  %v333_v29 = vpop.permute.xlu0 %332 }
 0x11d   : > { %v971_v31 = vsel %vm960_vm4, %v954_v10, %v420_v46  ;;  %v955_v48 = vsel %vm943_vm3, %v1961_v53, %v333_v29 }
 0x120   : > { %v728_v38 = vpop.permute.xlu1 %727  ;;  %v666_v30 = vpop.permute.xlu0 %665 }
 0x121   : > { %v1037_v54 = vsel %vm1028_vm8, %v1020_v55, %v728_v38  ;;  %v1021_v4 = vsel %vm1011_vm7, %v1004_v33, %v666_v30 }
 0x124   : > { %v484_v36 = vpop.permute.xlu1 %483  ;;  %v422_v37 = vpop.permute.xlu0 %421 }
 0x125   : > { %v988_v19 = vsel %vm977_vm5, %v971_v31, %v484_v36  ;;  %v972_v3 = vsel %vm960_vm4, %v955_v48, %v422_v37 }
 0x128   : > { %v824_v41 = vpop.permute.xlu1 %823  ;;  %v730_v39 = vpop.permute.xlu0 %729 }
 0x129   : > { %v1054_v57 = vsel %vm1045_vm9, %v1037_v54, %v824_v41  ;;  %v1038_v5 = vsel %vm1028_vm8, %v1021_v4, %v730_v39 }
 0x12c   : > { %v580_v62 = vpop.permute.xlu1 %579  ;;  %v486_v25 = vpop.permute.xlu0 %485 }
 0x12d   : > { %v1005_v34 = vsel %vm994_vm6, %v988_v19, %v580_v62  ;;  %v989_v61 = vsel %vm977_vm5, %v972_v3, %v486_v25 }
 0x130   : > { %v912_v28 = vpop.permute.xlu1 %911  ;;  %v826_v60 = vpop.permute.xlu0 %825 }
 0x131   : > { %v1071_v18 = vsel %vm1062_vm10, %v1054_v57, %v912_v28  ;;  %v1055_v6 = vsel %vm1045_vm9, %v1038_v5, %v826_v60 }
 0x132   : > { %1590 = vmatprep.mubr.msk.f32.mxu1 %vm1084_vm11, %v1071_v18 }
 0x134   : > { %v582_v51 = vpop.permute.xlu1 %581  ;;  %v335_v63 = vpop.permute.xlu0 %334 }
 0x135   : > { %v1006_v22 = vsel %vm994_vm6, %v989_v61, %v582_v51  ;;  %v956_v25 = vsel %vm943_vm3, %v2015_v2, %v335_v63 }
 0x138   : > { %v914_v0 = vpop.permute.xlu1 %913  ;;  %v668_v15 = vpop.permute.xlu0 %667 }
 0x139   : > { %v1072_v24 = vsel %vm1062_vm10, %v1055_v6, %v914_v0  ;;  %v1022_v56 = vsel %vm1011_vm7, %v1005_v34, %v668_v15 }
 0x13a   : > { %1591 = vmatmul.mubr.msk.f32.vlgmr.msra.gmra.mrb[0].mxu1 %vm1084_vm11, %v1072_v24 }
 0x13c   : > { %v424_v35 = vpop.permute.xlu1 %423  ;;  %v337_v14 = vpop.permute.xlu0 %336 }
 0x13d   : > { %v973_v52 = vsel %vm960_vm4, %v956_v25, %v424_v35  ;;  %v957_v2 = vsel %vm943_vm3, %v2025_v40, %v337_v14 }
 0x140   : > { %v732_v50 = vpop.permute.xlu1 %731  ;;  %v670_v8 = vpop.permute.xlu0 %669 }
 0x141   : > { %v1039_v9 = vsel %vm1028_vm8, %v1022_v56, %v732_v50  ;;  %v1023_v43 = vsel %vm1011_vm7, %v1006_v22, %v670_v8 }
 0x144   : > { %v488_v26 = vpop.permute.xlu1 %487  ;;  %v426_v58 = vpop.permute.xlu0 %425 }
 0x145   : > { %v990_v55 = vsel %vm977_vm5, %v973_v52, %v488_v26  ;;  %v974_v63 = vsel %vm960_vm4, %v957_v2, %v426_v58 }
 0x148   : > { %v828_v7 = vpop.permute.xlu1 %827  ;;  %v734_v23 = vpop.permute.xlu0 %733 }
 0x149   : > { %v1056_v13 = vsel %vm1045_vm9, %v1039_v9, %v828_v7  ;;  %v1040_v46 = vsel %vm1028_vm8, %v1023_v43, %v734_v23 }
 0x14c   : > { %v584_v42 = vpop.permute.xlu1 %583  ;;  %v490_v12 = vpop.permute.xlu0 %489 }
 0x14d   : > { %v1007_v28 = vsel %vm994_vm6, %v990_v55, %v584_v42  ;;  %v991_v33 = vsel %vm977_vm5, %v974_v63, %v490_v12 }
 0x150   : > { %v916_v16 = vpop.permute.xlu1 %915  ;;  %v830_v59 = vpop.permute.xlu0 %829 }
 0x151   : > { %v1073_v17 = vsel %vm1062_vm10, %v1056_v13, %v916_v16  ;;  %v1057_v38 = vsel %vm1045_vm9, %v1040_v46, %v830_v59 }
 0x152   : > { %1593 = vmatprep.mubr.msk.f32.mxu1 %vm1084_vm11, %v1073_v17 }
 0x154   : > { %v586_v27 = vpop.permute.xlu1 %585  ;;  %v339_v20 = vpop.permute.xlu0 %338 }
 0x155   : > { %v1008_v6 = vsel %vm994_vm6, %v991_v33, %v586_v27  ;;  %v958_v26 = vsel %vm943_vm3, %v2098_v44, %v339_v20 }
 0x158   : > { %v918_v30 = vpop.permute.xlu1 %917  ;;  %v672_v36 = vpop.permute.xlu0 %671 }
 0x159   : > { %v1074_v53 = vsel %vm1062_vm10, %v1057_v38, %v918_v30  ;;  %v1024_v60 = vsel %vm1011_vm7, %v1007_v28, %v672_v36 }
 0x15a   : > { %1594 = vmatmul.mubr.msk.f32.gmra.mrb[2].mxu1 %vm1084_vm11, %v1074_v53 }
 0x15c   : > { %v428_v29 = vpop.permute.xlu1 %427  ;;  %v341_v37 = vpop.permute.xlu0 %340 }
 0x15d   : > { %v959_v58 = vsel %vm943_vm3, %v2108_v1, %v341_v37  ;;  %v975_v7 = vsel %vm960_vm4, %v958_v26, %v428_v29 }
 0x160   : > { %v736_v41 = vpop.permute.xlu1 %735  ;;  %v674_v39 = vpop.permute.xlu0 %673 }
 0x161   : > { %v1041_v18 = vsel %vm1028_vm8, %v1024_v60, %v736_v41  ;;  %v1025_v0 = vsel %vm1011_vm7, %v1008_v6, %v674_v39 }
 0x164   : > { %v492_v45 = vpop.permute.xlu1 %491  ;;  %v430_v47 = vpop.permute.xlu0 %429 }
 0x165   : > { %v976_v23 = vsel %vm960_vm4, %v959_v58, %v430_v47  ;;  %v992_v10 = vsel %vm977_vm5, %v975_v7, %v492_v45 }
 0x168   : > { %v832_v49 = vpop.permute.xlu1 %831  ;;  %v738_v62 = vpop.permute.xlu0 %737 }
 0x169   : > { %v1058_v21 = vsel %vm1045_vm9, %v1041_v18, %v832_v49  ;;  %v1042_v15 = vsel %vm1028_vm8, %v1025_v0, %v738_v62 }
 0x16c   : > { %v588_v54 = vpop.permute.xlu1 %587  ;;  %v494_v57 = vpop.permute.xlu0 %493 }
 0x16d   : > { %v993_v31 = vsel %vm977_vm5, %v976_v23, %v494_v57  ;;  %v1009_v12 = vsel %vm994_vm6, %v992_v10, %v588_v54 }
 0x170   : > { %v920_v11 = vpop.permute.xlu1 %919  ;;  %v834_v32 = vpop.permute.xlu0 %833 }
 0x171   : > { %v1075_v51 = vsel %vm1062_vm10, %v1058_v21, %v920_v11  ;;  %v1059_v24 = vsel %vm1045_vm9, %v1042_v15, %v834_v32 }
 0x172   : > { %1596 = vmatprep.mubr.msk.f32.mxu1 %vm1084_vm11, %v1075_v51 }
 0x174   : > { %v676_v4 = vpop.permute.xlu1 %675  ;;  %v590_v5 = vpop.permute.xlu0 %589 }
 0x175   : > { %v1010_v34 = vsel %vm994_vm6, %v993_v31, %v590_v5  ;;  %v1026_v56 = vsel %vm1011_vm7, %v1009_v12, %v676_v4 }
 0x178   : > { %v678_v35 = vpop.permute.xlu1 %677  ;;  %v922_v50 = vpop.permute.xlu0 %921 }
 0x179   : > { %v1076_v40 = vsel %vm1062_vm10, %v1059_v24, %v922_v50  ;;  %v1027_v44 = vsel %vm1011_vm7, %v1010_v34, %v678_v35 }
 0x17a   : > { %1597 = vmatmul.mubr.msk.f32.gmra.mrb[4].mxu1 %vm1084_vm11, %v1076_v40 }
 0x17c   : > { %v742_v14 = vpop.permute.xlu1 %741  ;;  %v740_v8 = vpop.permute.xlu0 %739 }
 0x17d   : > { %v1044_v1 = vsel %vm1028_vm8, %v1027_v44, %v742_v14  ;;  %v1043_v9 = vsel %vm1028_vm8, %v1026_v56, %v740_v8 }
 0x180   : > { %v838_v19 = vpop.permute.xlu1 %837  ;;  %v836_v42 = vpop.permute.xlu0 %835 }
 0x181   : > { %v1061_v13 = vsel %vm1045_vm9, %v1044_v1, %v838_v19  ;;  %v1060_v16 = vsel %vm1045_vm9, %v1043_v9, %v836_v42 }
 0x184   : > { %v926_v59 = vpop.permute.xlu1 %925  ;;  %v924_v17 = vpop.permute.xlu0 %923 }
 0x185   : > { %v1078_v48 = vsel %vm1062_vm10, %v1061_v13, %v926_v59  ;;  %v1077_v3 = vsel %vm1062_vm10, %v1060_v16, %v924_v17 }
 0x186   : > { %1599 = vmatprep.mubr.msk.f32.mxu1 %vm1084_vm11, %v1077_v3 }
 0x187   : > { %1600 = vmatmul.mubr.msk.f32.gmra.mrb[6].mxu1 %vm1084_vm11, %v1078_v48 }
 0x18e   : > { %v1580_v61 = vpop.f32.mrb[0].mxu0 }
 0x18f   : > { %v1283_v27 = vsel %vm1062_vm10, %v1580_v61, 0.0  ;;  %v1320_v20 = vmul.f32 %v1580_v61, %v1580_v61  ;;  %v1203_v22 = vpop.f32.mrb[1].mxu0 }
 0x190   : > { %v1282_v43 = vsel %vm1062_vm10, %v1203_v22, 0.0  ;;  %v1319_v46 = vmul.f32 %v1203_v22, %v1203_v22 }
 0x191   : > { %v1336_v38 = vsel %vm1062_vm10, %v1320_v20, 0.0  ;;  %v1284_v30 = vadd.f32 %v1283_v27, %v1282_v43 }
 0x192   : > { %v1335_v36 = vsel %vm1062_vm10, %v1319_v46, 0.0 }
 0x193   : > { %v1337_v53 = vadd.f32 %v1336_v38, %v1335_v36 }
 0x1ae   : > { %v1583_v29 = vpop.f32.mrb[2].mxu0 }
 0x1af   : > { %v1213_v37 = vpop.f32.mrb[3].mxu0  ;;  %v1322_v41 = vmul.f32 %v1583_v29, %v1583_v29  ;;  %v1287_v49 = vsel %vm1062_vm10, %v1583_v29, 0.0 }
 0x1b0   : > { %v1285_v39 = vsel %vm1062_vm10, %v1213_v37, 0.0  ;;  %v1321_v45 = vmul.f32 %v1213_v37, %v1213_v37 }
 0x1b1   : > { %v1286_v47 = vadd.f32 %v1285_v39, %v1284_v30  ;;  %v1340_v55 = vsel %vm1062_vm10, %v1322_v41, 0.0 }
 0x1b2   : > { %v1338_v62 = vsel %vm1062_vm10, %v1321_v45, 0.0 }
 0x1b3   : > { %v1339_v25 = vadd.f32 %v1338_v62, %v1337_v53  ;;  %v1288_v52 = vadd.f32 %v1287_v49, %v1286_v47 }
 0x1b5   : > { %v1341_v54 = vadd.f32 %v1340_v55, %v1339_v25 }
 0x1ce   : > { %v1586_v57 = vpop.f32.mrb[4].mxu0 }
 0x1cf   : > { %v1223_v28 = vpop.f32.mrb[5].mxu0  ;;  %v1324_v60 = vmul.f32 %v1586_v57, %v1586_v57  ;;  %v1291_v32 = vsel %vm1062_vm10, %v1586_v57, 0.0 }
 0x1d0   : > { %v1289_v18 = vsel %vm1062_vm10, %v1223_v28, 0.0  ;;  %v1323_v21 = vmul.f32 %v1223_v28, %v1223_v28 }
 0x1d1   : > { %v1290_v11 = vadd.f32 %v1289_v18, %v1288_v52  ;;  %v1344_v33 = vsel %vm1062_vm10, %v1324_v60, 0.0 }
 0x1d2   : > { %v1342_v51 = vsel %vm1062_vm10, %v1323_v21, 0.0 }
 0x1d3   : > { %v1343_v2 = vadd.f32 %v1342_v51, %v1341_v54  ;;  %v1292_v63 = vadd.f32 %v1291_v32, %v1290_v11 }
 0x1d5   : > { %v1345_v4 = vadd.f32 %v1344_v33, %v1343_v2 }
 0x1ed   : > { %v1589_v5 = vpop.f32.mrb[6].mxu0 }
 0x1ee   : > { %v1233_v6 = vpop.f32.mrb[7].mxu0  ;;  %v1326_v0 = vmul.f32 %v1589_v5, %v1589_v5  ;;  %v1295_v50 = vsel %vm1062_vm10, %v1589_v5, 0.0 }
 0x1ef   : > { %v1293_v15 = vsel %vm1062_vm10, %v1233_v6, 0.0  ;;  %v1325_v24 = vmul.f32 %v1233_v6, %v1233_v6 }
 0x1f0   : > { %v1294_v35 = vadd.f32 %v1293_v15, %v1292_v63  ;;  %v1348_v26 = vsel %vm1062_vm10, %v1326_v0, 0.0 }
 0x1f1   : > { %v1346_v40 = vsel %vm1062_vm10, %v1325_v24, 0.0 }
 0x1f2   : > { %v1296_v14 = vadd.f32 %v1295_v50, %v1294_v35  ;;  %v1347_v8 = vadd.f32 %v1346_v40, %v1345_v4 }
 0x1f4   : > { %v1349_v58 = vadd.f32 %v1348_v26, %v1347_v8 }
 0x20d   : > { %v1592_v7 = vpop.f32.mrb[0].mxu1 }
 0x20e   : > { %v1243_v23 = vpop.f32.mrb[1].mxu1  ;;  %v1328_v10 = vmul.f32 %v1592_v7, %v1592_v7  ;;  %v1299_v12 = vsel %vm1062_vm10, %v1592_v7, 0.0 }
 0x20f   : > { %v1297_v31 = vsel %vm1062_vm10, %v1243_v23, 0.0  ;;  %v1327_v19 = vmul.f32 %v1243_v23, %v1243_v23 }
 0x210   : > { %v1298_v42 = vadd.f32 %v1297_v31, %v1296_v14  ;;  %v1352_v1 = vsel %vm1062_vm10, %v1328_v10, 0.0 }
 0x211   : > { %v1350_v34 = vsel %vm1062_vm10, %v1327_v19, 0.0 }
 0x212   : > { %v1351_v56 = vadd.f32 %v1350_v34, %v1349_v58  ;;  %v1300_v44 = vadd.f32 %v1299_v12, %v1298_v42 }
 0x214   : > { %v1353_v9 = vadd.f32 %v1352_v1, %v1351_v56 }
 0x22d   : > { %v1595_v13 = vpop.f32.mrb[2].mxu1 }
 0x22e   : > { %v1253_v16 = vpop.f32.mrb[3].mxu1  ;;  %v1330_v59 = vmul.f32 %v1595_v13, %v1595_v13  ;;  %v1303_v61 = vsel %vm1062_vm10, %v1595_v13, 0.0 }
 0x22f   : > { %v1301_v17 = vsel %vm1062_vm10, %v1253_v16, 0.0  ;;  %v1329_v48 = vmul.f32 %v1253_v16, %v1253_v16 }
 0x230   : > { %v1302_v3 = vadd.f32 %v1301_v17, %v1300_v44  ;;  %v1356_v43 = vsel %vm1062_vm10, %v1330_v59, 0.0 }
 0x231   : > { %v1354_v27 = vsel %vm1062_vm10, %v1329_v48, 0.0 }
 0x232   : > { %v1355_v20 = vadd.f32 %v1354_v27, %v1353_v9  ;;  %v1304_v22 = vadd.f32 %v1303_v61, %v1302_v3 }
 0x234   : > { %v1357_v46 = vadd.f32 %v1356_v43, %v1355_v20 }
 0x24d   : > { %v1598_v38 = vpop.f32.mrb[4].mxu1 }
 0x24e   : > { %v1263_v30 = vpop.f32.mrb[5].mxu1  ;;  %v1332_v36 = vmul.f32 %v1598_v38, %v1598_v38  ;;  %v1307_v41 = vsel %vm1062_vm10, %v1598_v38, 0.0 }
 0x24f   : > { %v1305_v53 = vsel %vm1062_vm10, %v1263_v30, 0.0  ;;  %v1331_v29 = vmul.f32 %v1263_v30, %v1263_v30 }
 0x250   : > { %v1306_v37 = vadd.f32 %v1305_v53, %v1304_v22  ;;  %v1360_v49 = vsel %vm1062_vm10, %v1332_v36, 0.0 }
 0x251   : > { %v1358_v39 = vsel %vm1062_vm10, %v1331_v29, 0.0 }
 0x252   : > { %v1359_v45 = vadd.f32 %v1358_v39, %v1357_v46  ;;  %v1308_v47 = vadd.f32 %v1307_v41, %v1306_v37 }
 0x254   : > { %v1361_v62 = vadd.f32 %v1360_v49, %v1359_v45 }
 0x25a   : > { %v1601_v25 = vpop.f32.mrb[6].mxu1 }
 0x25b   : > { %v1273_v52 = vpop.f32.mrb[7].mxu1  ;;  %v1334_v55 = vmul.f32 %v1601_v25, %v1601_v25  ;;  %v1311_v60 = vsel %vm1062_vm10, %v1601_v25, 0.0 }
 0x25c   : > { %v1309_v54 = vsel %vm1062_vm10, %v1273_v52, 0.0  ;;  %v1333_v57 = vmul.f32 %v1273_v52, %v1273_v52 }
 0x25d   : > { %v1310_v28 = vadd.f32 %v1309_v54, %v1308_v47  ;;  %v1364_v32 = vsel %vm1062_vm10, %v1334_v55, 0.0 }
 0x25e   : > { %v1362_v18 = vsel %vm1062_vm10, %v1333_v57, 0.0 }
 0x25f   : > { %v1312_v21 = vadd.f32 %v1311_v60, %v1310_v28  ;;  %v1363_v11 = vadd.f32 %v1362_v18, %v1361_v62 }
 0x261   : > { %v1313_v51 = vrot.slane %v1312_v21, 4  ;;  %v1365_v2 = vadd.f32 %v1364_v32, %v1363_v11 }
 0x263   : > { %v1314_v63 = vadd.f32 %v1313_v51, %v1312_v21  ;;  %v1366_v33 = vrot.slane %v1365_v2, 4 }
 0x265   : > { %v1315_v4 = vrot.slane %v1314_v63, 2  ;;  %v1367_v5 = vadd.f32 %v1366_v33, %v1365_v2 }
 0x267   : > { %v1316_v6 = vadd.f32 %v1315_v4, %v1314_v63  ;;  %v1368_v0 = vrot.slane %v1367_v5, 2 }
 0x269   : > { %v1317_v15 = vrot.slane %v1316_v6, 1  ;;  %v1369_v24 = vadd.f32 %v1368_v0, %v1367_v5 }
 0x26b   : > { %v1370_v35 = vrot.slane %v1369_v24, 1  ;;  %v1318_v50 = vadd.f32 %v1317_v15, %v1316_v6 }
 0x26d   : > { %v1371_v40 = vadd.f32 %v1370_v35, %v1369_v24 }
 0x26f   : > { %v1373_v14 = vsel %vm1372_vm12, %v1318_v50, %v1371_v40 }
 0x270   : > { %1375 = vst.msk [vmem:[%s163_s24] sm:$0x3] %vm1374_vm13, %v1373_v14 }
 0x271 PF: > { %s12_s13 = sadd.s32 1, %s1703_s13   ;;  %s2426_s9 = smov %s1695_s11 }
 0x272   : > { %p9_p7 = scmp.ge.s32.totalorder %s12_s13, 6   ;;  %s2427_s10 = smov %s1699_s12 }
 0x273   : > { %s2428_s11 = smov %s2431_s14  ;;  %s2429_s12 = smov %s2435_s15 }
 0x274   :  { %11 = sbr.rel (!%p9_p7) target bundleno = 3 (0x3), region = 61 }

</bundles_post_ra>
